<compile_context>
chip_gen: v7x
topology: tpu7x:2x2x1
jax: 0.10.0
libtpu: 0.0.40
codegen_flags: <defaults>
</compile_context>

<pallas_src>
import numpy as np

import jax
import jax.numpy as jnp
from jax import lax
from jax.experimental import pallas as pl
from jax.experimental.pallas import tpu as pltpu


# ---------------------------------------------------------------------------
# Host-side constant helpers.
# ---------------------------------------------------------------------------
def _bilinear_up2_matrix_t(n):
    """(n, 2n) transposed 1-D bilinear x2 interpolation matrix, align_corners=False."""
    u = np.zeros((2 * n, n), dtype=np.float64)
    for o in range(2 * n):
        src = (o + 0.5) / 2.0 - 0.5
        i0 = int(np.floor(src))
        f = src - i0
        lo = min(max(i0, 0), n - 1)
        hi = min(max(i0 + 1, 0), n - 1)
        u[o, lo] += 1.0 - f
        u[o, hi] += f
    return np.ascontiguousarray(u.T).astype(np.float32)          # (n, 2n)


def _column_masks(h, w):
    """(2, h*w) validity masks for horizontal taps dw = -1 and dw = +1."""
    col = np.arange(h * w) % w
    m = np.stack([col - 1 >= 0, col + 1 <= w - 1], axis=0)
    return m.astype(np.float32)


def _fold_bn_params(layer_params, eps):
    """Fold eval-mode BN into the conv weights; weights rounded to bf16 (MXU operands).

    Returns per layer: (w1 bf16 (Cmid, Cin), b1 f32 (Cmid,),
                        w3 bf16 (Cmid, 9*Cmid) [tap-major: (kh*3+kw)*Cmid + c],
                        b3 f32 (Cmid,)).
    """
    folded = []
    for p in layer_params:
        cmid, cin = p['w1'].shape[0], p['w1'].shape[1]
        g1, be1, mu1, v1 = p['bn1']
        s1 = g1 / jnp.sqrt(v1 + eps)
        w1 = (p['w1'].reshape(cmid, cin) * s1[:, None]).astype(jnp.bfloat16)
        b1 = (be1 - mu1 * s1).astype(jnp.float32)
        g3, be3, mu3, v3 = p['bn3']
        s3 = g3 / jnp.sqrt(v3 + eps)
        w3 = (jnp.transpose(p['w3'], (0, 2, 3, 1)).reshape(cmid, 9 * cmid)
              * s3[:, None]).astype(jnp.bfloat16)
        b3 = (be3 - mu3 * s3).astype(jnp.float32)
        folded.append((w1, b1, w3, b3))
    return folded


# ---------------------------------------------------------------------------
# Fused decoder kernel.
# ---------------------------------------------------------------------------
def _make_decoder_kernel(n_layers, layer_dims, upsample_flags, lpad, n_inputs, has_xup):
    taps = [(dh, dw) for dh in (-1, 0, 1) for dw in (-1, 0, 1)]

    def kernel(*refs):
        o_ref = refs[n_inputs]
        ypad_ref = refs[n_inputs + 1]                  # (cmax, lpad + max(hw+ww+1))
        xup_ref = refs[n_inputs + 2] if has_xup else None

        x = refs[0][...].astype(jnp.float32)           # (Cin, H*W)
        idx = 1
        for i in range(n_layers):
            cin, cmid, hh, ww = layer_dims[i]
            hw = hh * ww
            last = (i == n_layers - 1)
            mask_ref = refs[idx]
            w1_ref, b1_ref = refs[idx + 1], refs[idx + 2]
            w3_ref, b3_ref = refs[idx + 3], refs[idx + 4]
            idx += 5

            # --- 1x1 conv (BN folded) : bf16 operands on the MXU, f32 accumulate ---
            y = jnp.dot(w1_ref[...], x.astype(jnp.bfloat16),
                        preferred_element_type=jnp.float32)
            y = y + b1_ref[...]
            y = jnp.maximum(y, 0.01 * y)               # LeakyReLU(0.01), (cmid, hw)

            # --- 3x3 conv, padding=1: accumulate over the 9 taps ------------------
            # Zero ONLY the halo columns actually read, write the interior once,
            # then read shifted windows; the per-tap column mask kills row wrap.
            wp = ww + 1
            zero_halo = jnp.zeros((cmid, wp), jnp.float32)
            ypad_ref[0:cmid, lpad - wp:lpad] = zero_halo
            ypad_ref[0:cmid, lpad + hw:lpad + hw + wp] = zero_halo
            ypad_ref[0:cmid, lpad:lpad + hw] = y

            w3 = w3_ref[...]                                          # (cmid, 9*cmid) bf16
            m_l = jnp.broadcast_to(mask_ref[0:1, 0:hw], (cmid, hw))   # dw == -1
            m_r = jnp.broadcast_to(mask_ref[1:2, 0:hw], (cmid, hw))   # dw == +1
            z = None
            for t, (dh, dw) in enumerate(taps):
                k = dh * ww + dw
                shifted = ypad_ref[0:cmid, lpad + k:lpad + k + hw]
                if dw == -1:
                    shifted = shifted * m_l
                elif dw == 1:
                    shifted = shifted * m_r
                part = jnp.dot(w3[:, t * cmid:(t + 1) * cmid],
                               shifted.astype(jnp.bfloat16),
                               preferred_element_type=jnp.float32)
                z = part if z is None else z + part
            z = z + b3_ref[...]
            z = jnp.maximum(z, 0.01 * z)               # (cmid, hw) f32

            # --- bilinear x2 upsample (align_corners=False), separable ------------
            # W direction: one tiny (ww, 2*ww) matmul per row.
            # H direction: fixed 0.25 / 0.75 lerp of neighbouring rows (VPU),
            #              boundary rows replicate (clamp).
            if upsample_flags[i]:
                uw_ref = refs[idx]
                idx += 1
                tw = 2 * ww
                uw = uw_ref[...]                        # (ww, 2*ww) f32

                def wup(r, _z=z, _ww=ww, _uw=uw):
                    return jnp.dot(_z[:, r * _ww:(r + 1) * _ww], _uw,
                                   preferred_element_type=jnp.float32)

                cur = wup(0)
                prv = cur                               # clamp: row -1 -> row 0
                for r in range(hh):
                    nxt = wup(r + 1) if r + 1 < hh else cur   # clamp: row hh -> hh-1
                    even = 0.25 * prv + 0.75 * cur
                    odd = 0.75 * cur + 0.25 * nxt
                    if last:
                        o_ref[:, (2 * r) * tw:(2 * r + 1) * tw] = even.astype(o_ref.dtype)
                        o_ref[:, (2 * r + 1) * tw:(2 * r + 2) * tw] = odd.astype(o_ref.dtype)
                    else:
                        xup_ref[0:cmid, (2 * r) * tw:(2 * r + 1) * tw] = even
                        xup_ref[0:cmid, (2 * r + 1) * tw:(2 * r + 2) * tw] = odd
                    prv, cur = cur, nxt
                if not last:
                    x = xup_ref[0:cmid, 0:4 * hw]
            else:
                if last:
                    o_ref[...] = z.astype(o_ref.dtype)
                else:
                    x = z

    return kernel


def decoder_forward(x_nchw, layer_params, *, n_layers, use_upsample=True, eps=1e-5):
    """Forward of Decoder (eval-mode BN). x_nchw: (N, C, H, W) f32."""
    n, c0, h0, w0 = x_nchw.shape
    assert c0 % (2 ** n_layers) == 0, (c0, n_layers)

    folded = _fold_bn_params(layer_params, eps)

    kernel_inputs = [x_nchw.reshape(n, c0, h0 * w0)]
    in_specs = [pl.BlockSpec((None, c0, h0 * w0), lambda b: (b, 0, 0))]

    layer_dims, upsample_flags = [], []
    cin, hh, ww = c0, h0, w0
    cmax = wmax = pad_need = 0
    xup_rows = xup_cols = 0
    flops = 0
    for i in range(n_layers):
        cmid = cin // 2
        hw = hh * ww
        layer_dims.append((cin, cmid, hh, ww))
        cmax = max(cmax, cmid)
        wmax = max(wmax, ww)
        pad_need = max(pad_need, hw + ww + 1)

        w1, b1, w3, b3 = folded[i]
        masks = jnp.asarray(_column_masks(hh, ww))
        for t in (masks, w1, b1[:, None], w3, b3[:, None]):
            kernel_inputs.append(t)
            in_specs.append(pl.BlockSpec(tuple(t.shape), lambda b: (0, 0)))

        flops += n * (2 * cmid * cin * hw + 2 * cmid * (9 * cmid) * hw)

        up = bool(use_upsample) and ((i - 1) % 2 == 0)
        upsample_flags.append(up)
        if up:
            uw_t = jnp.asarray(_bilinear_up2_matrix_t(ww))       # (ww, 2*ww)
            kernel_inputs.append(uw_t)
            in_specs.append(pl.BlockSpec(tuple(uw_t.shape), lambda b: (0, 0)))
            flops += n * 2 * cmid * hw * (2 * ww)                # separable W step
            if i != n_layers - 1:
                xup_rows = max(xup_rows, cmid)
                xup_cols = max(xup_cols, 4 * hw)
            hh, ww = 2 * hh, 2 * ww
        cin = cmid

    c_out, hw_out = cin, hh * ww
    lpad = 128 * ((wmax + 1 + 127) // 128)                       # lane-aligned interior
    has_xup = xup_rows > 0

    scratch_shapes = [pltpu.VMEM((cmax, lpad + pad_need), jnp.float32)]
    scratch_elems = cmax * (lpad + pad_need)
    if has_xup:
        scratch_shapes.append(pltpu.VMEM((xup_rows, xup_cols), jnp.float32))
        scratch_elems += xup_rows * xup_cols

    # Explicit VMEM budget from the actual resident set (constants are small here);
    # the clamp keeps it valid on v5e/v6e (128 MiB) and v7x (64 MiB physical).
    const_bytes = sum(int(np.prod(a.shape)) * a.dtype.itemsize for a in kernel_inputs[1:])
    io_bytes = (c0 * h0 * w0 + c_out * hw_out) * 4
    resident = 2 * const_bytes + 2 * io_bytes + scratch_elems * 4
    vmem_limit = int(min(max(2 * resident + (16 << 20), 32 << 20), 56 << 20))

    bytes_accessed = n * (const_bytes + io_bytes)

    n_inputs = len(kernel_inputs)
    kernel = _make_decoder_kernel(n_layers, tuple(layer_dims), tuple(upsample_flags),
                                  lpad, n_inputs, has_xup)

    y = pl.pallas_call(
        kernel,
        out_shape=jax.ShapeDtypeStruct((n, c_out, hw_out), x_nchw.dtype),
        grid=(n,),
        in_specs=in_specs,
        out_specs=pl.BlockSpec((None, c_out, hw_out), lambda b: (b, 0, 0)),
        scratch_shapes=scratch_shapes,
        compiler_params=pltpu.CompilerParams(
            dimension_semantics=("parallel",),
            vmem_limit_bytes=vmem_limit),
        cost_estimate=pl.CostEstimate(flops=int(flops), transcendentals=0,
                                      bytes_accessed=int(bytes_accessed)),
    )(*kernel_inputs)
    return y.reshape(n, c_out, hh, ww)


# ---------------------------------------------------------------------------
# Pure-JAX reference implementing the SAME mixed-precision policy as the kernel
# (eval-mode BN folded into the conv weights, bf16-rounded weights and conv
# inputs, f32 accumulation, f32 bias / LeakyReLU / bilinear upsample) so the
# comparison below is tight and any indexing / masking / upsampling bug shows
# up as an O(1) error.
# ---------------------------------------------------------------------------
def _reference(x, layer_params, *, n_layers, use_upsample, eps):
    folded = _fold_bn_params(layer_params, eps)
    y = x
    for i in range(n_layers):
        w1, b1, w3, b3 = folded[i]
        cmid, cin = w1.shape
        w1f = w1.astype(jnp.float32).reshape(cmid, cin, 1, 1)
        w3f = jnp.transpose(w3.astype(jnp.float32).reshape(cmid, 3, 3, cmid),
                            (0, 3, 1, 2))
        yb = y.astype(jnp.bfloat16).astype(jnp.float32)
        y = lax.conv_general_dilated(
            yb, w1f, window_strides=(1, 1), padding=((0, 0), (0, 0)),
            dimension_numbers=('NCHW', 'OIHW', 'NCHW'),
            precision=lax.Precision.HIGHEST)
        y = y + b1[None, :, None, None]
        y = jnp.maximum(y, 0.01 * y)
        yb = y.astype(jnp.bfloat16).astype(jnp.float32)
        y = lax.conv_general_dilated(
            yb, w3f, window_strides=(1, 1), padding=((1, 1), (1, 1)),
            dimension_numbers=('NCHW', 'OIHW', 'NCHW'),
            precision=lax.Precision.HIGHEST)
        y = y + b3[None, :, None, None]
        y = jnp.maximum(y, 0.01 * y)
        if use_upsample and (i - 1) % 2 == 0:
            nb, nc, nh, nw = y.shape
            y = jax.image.resize(y, (nb, nc, 2 * nh, 2 * nw), method='bilinear')
    return y


if __name__ == "__main__":
    # Decoder(in_channels=16, n_layers=2, use_upsample=True) on a (2, 16, 16, 16) input.
    batch, in_channels, height, width = 2, 16, 16, 16
    n_layers = 2
    use_upsample = True
    eps = 1e-5

    key = jax.random.PRNGKey(0)
    key, kx = jax.random.split(key)
    x = jax.random.normal(kx, (batch, in_channels, height, width), dtype=jnp.float32)

    layer_params = []
    cin = in_channels
    for i in range(n_layers):
        cmid = cin // 2
        key, k1, k3, kg1, kb1, km1, kv1, kg3, kb3, km3, kv3 = jax.random.split(key, 11)
        w1 = 0.3 * jax.random.normal(k1, (cmid, cin, 1, 1), dtype=jnp.float32)
        w3 = 0.15 * jax.random.normal(k3, (cmid, cmid, 3, 3), dtype=jnp.float32)
        bn1 = (1.0 + 0.1 * jax.random.normal(kg1, (cmid,), dtype=jnp.float32),
               0.1 * jax.random.normal(kb1, (cmid,), dtype=jnp.float32),
               0.1 * jax.random.normal(km1, (cmid,), dtype=jnp.float32),
               0.5 + jnp.abs(jax.random.normal(kv1, (cmid,), dtype=jnp.float32)))
        bn3 = (1.0 + 0.1 * jax.random.normal(kg3, (cmid,), dtype=jnp.float32),
               0.1 * jax.random.normal(kb3, (cmid,), dtype=jnp.float32),
               0.1 * jax.random.normal(km3, (cmid,), dtype=jnp.float32),
               0.5 + jnp.abs(jax.random.normal(kv3, (cmid,), dtype=jnp.float32)))
        layer_params.append(dict(w1=w1, bn1=bn1, w3=w3, bn3=bn3))
        cin = cmid

    out = decoder_forward(x, layer_params, n_layers=n_layers,
                          use_upsample=use_upsample, eps=eps)
    out = jax.block_until_ready(out)

    ref = _reference(x, layer_params, n_layers=n_layers,
                     use_upsample=use_upsample, eps=eps)
    ref = jax.block_until_ready(ref)

    expected_shape = (batch, in_channels // 2 ** n_layers, 2 * height, 2 * width)
    assert out.shape == expected_shape, out.shape
    assert ref.shape == expected_shape, ref.shape
    max_err = float(jnp.max(jnp.abs(out - ref)))
    # Reference mirrors the kernel's bf16-operand / f32-accumulate policy, so the
    # tolerance is tighter than before; real indexing / masking / upsampling bugs
    # would give O(1) errors.
    assert jnp.allclose(out, ref, atol=1e-2, rtol=1e-2), max_err
    print("KERNEL_OK")
</pallas_src>

<mosaic_0001>
module attributes {stable_mosaic.version = 11 : i64} {
  func.func @kernel(%arg0: i32, %arg1: memref<1x16x256xf32, #tpu.memory_space<vmem>>, %arg2: memref<2x256xf32, #tpu.memory_space<vmem>>, %arg3: memref<8x16xbf16, #tpu.memory_space<vmem>>, %arg4: memref<8x1xf32, #tpu.memory_space<vmem>>, %arg5: memref<8x72xbf16, #tpu.memory_space<vmem>>, %arg6: memref<8x1xf32, #tpu.memory_space<vmem>>, %arg7: memref<2x256xf32, #tpu.memory_space<vmem>>, %arg8: memref<4x8xbf16, #tpu.memory_space<vmem>>, %arg9: memref<4x1xf32, #tpu.memory_space<vmem>>, %arg10: memref<4x36xbf16, #tpu.memory_space<vmem>>, %arg11: memref<4x1xf32, #tpu.memory_space<vmem>>, %arg12: memref<16x32xf32, #tpu.memory_space<vmem>>, %arg13: memref<1x4x1024xf32, #tpu.memory_space<vmem>>, %arg14: memref<8x401xf32, #tpu.memory_space<vmem>>) attributes {dimension_semantics = [#tpu.dimension_semantics<parallel>], iteration_bounds = array<i64: 2>, scalar_prefetch = 0 : i64, scratch_operands = 1 : i64, tpu.core_type = #tpu.core_type<tc>, window_params = [{transform_indices = @transform_0, window_bounds = array<i64: 1, 16, 256>}, {pipeline_mode = #tpu.pipeline_mode<synchronous>, transform_indices = @transform_1, window_bounds = array<i64: 2, 256>}, {pipeline_mode = #tpu.pipeline_mode<synchronous>, transform_indices = @transform_2, window_bounds = array<i64: 8, 16>}, {pipeline_mode = #tpu.pipeline_mode<synchronous>, transform_indices = @transform_3, window_bounds = array<i64: 8, 1>}, {pipeline_mode = #tpu.pipeline_mode<synchronous>, transform_indices = @transform_4, window_bounds = array<i64: 8, 72>}, {pipeline_mode = #tpu.pipeline_mode<synchronous>, transform_indices = @transform_5, window_bounds = array<i64: 8, 1>}, {pipeline_mode = #tpu.pipeline_mode<synchronous>, transform_indices = @transform_6, window_bounds = array<i64: 2, 256>}, {pipeline_mode = #tpu.pipeline_mode<synchronous>, transform_indices = @transform_7, window_bounds = array<i64: 4, 8>}, {pipeline_mode = #tpu.pipeline_mode<synchronous>, transform_indices = @transform_8, window_bounds = array<i64: 4, 1>}, {pipeline_mode = #tpu.pipeline_mode<synchronous>, transform_indices = @transform_9, window_bounds = array<i64: 4, 36>}, {pipeline_mode = #tpu.pipeline_mode<synchronous>, transform_indices = @transform_10, window_bounds = array<i64: 4, 1>}, {pipeline_mode = #tpu.pipeline_mode<synchronous>, transform_indices = @transform_11, window_bounds = array<i64: 16, 32>}, {transform_indices = @transform_12, window_bounds = array<i64: 1, 4, 1024>}]} {
    %c0 = arith.constant 0 : index
    %c0_0 = arith.constant 0 : index
    %c0_1 = arith.constant 0 : index
    %0 = vector.load %arg1[%c0, %c0_0, %c0_1] : memref<1x16x256xf32, #tpu.memory_space<vmem>>, vector<1x16x256xf32>
    %1 = vector.shape_cast %0 : vector<1x16x256xf32> to vector<16x256xf32>
    %c0_2 = arith.constant 0 : index
    %c0_3 = arith.constant 0 : index
    %2 = vector.load %arg3[%c0_2, %c0_3] : memref<8x16xbf16, #tpu.memory_space<vmem>>, vector<8x16xbf16>
    %3 = arith.truncf %1 : vector<16x256xf32> to vector<16x256xbf16>
    %cst = arith.constant dense<0.000000e+00> : vector<8x256xf32>
    %4 = tpu.matmul %2, %3, %cst {dimension_numbers = #tpu.dot_dimension_numbers<[1], [0], [0], [1], [0, 0, 1, 1], [], []>} : vector<8x16xbf16>, vector<16x256xbf16>, vector<8x256xf32> -> vector<8x256xf32>
    %c0_4 = arith.constant 0 : index
    %c0_5 = arith.constant 0 : index
    %5 = vector.load %arg4[%c0_4, %c0_5] : memref<8x1xf32, #tpu.memory_space<vmem>>, vector<8x1xf32>
    %6 = vector.broadcast %5 : vector<8x1xf32> to vector<8x256xf32>
    %7 = arith.addf %4, %6 : vector<8x256xf32>
    %cst_6 = arith.constant 0.00999999977 : f32
    %8 = vector.broadcast %cst_6 : f32 to vector<8x256xf32>
    %9 = arith.mulf %8, %7 : vector<8x256xf32>
    %10 = arith.maximumf %7, %9 : vector<8x256xf32>
    %cst_7 = arith.constant 0.000000e+00 : f32
    %11 = vector.broadcast %cst_7 : f32 to vector<8x17xf32>
    %c0_8 = arith.constant 0 : index
    %c111 = arith.constant 111 : index
    %12 = vector.load %arg14[%c0_8, %c111] : memref<8x401xf32, #tpu.memory_space<vmem>>, vector<8x17xf32>
    tpu.vector_store %arg14[%c0_8, %c111], %11 {strides = array<i32>} : memref<8x401xf32, #tpu.memory_space<vmem>>, vector<8x17xf32>,
    %c0_9 = arith.constant 0 : index
    %c384 = arith.constant 384 : index
    %13 = vector.load %arg14[%c0_9, %c384] : memref<8x401xf32, #tpu.memory_space<vmem>>, vector<8x17xf32>
    tpu.vector_store %arg14[%c0_9, %c384], %11 {strides = array<i32>} : memref<8x401xf32, #tpu.memory_space<vmem>>, vector<8x17xf32>,
    %c0_10 = arith.constant 0 : index
    %c128 = arith.constant 128 : index
    %14 = vector.load %arg14[%c0_10, %c128] : memref<8x401xf32, #tpu.memory_space<vmem>>, vector<8x256xf32>
    tpu.vector_store %arg14[%c0_10, %c128], %10 {strides = array<i32>} : memref<8x401xf32, #tpu.memory_space<vmem>>, vector<8x256xf32>,
    %c0_11 = arith.constant 0 : index
    %c0_12 = arith.constant 0 : index
    %15 = vector.load %arg5[%c0_11, %c0_12] : memref<8x72xbf16, #tpu.memory_space<vmem>>, vector<8x72xbf16>
    %c0_13 = arith.constant 0 : index
    %c0_14 = arith.constant 0 : index
    %16 = vector.load %arg2[%c0_13, %c0_14] : memref<2x256xf32, #tpu.memory_space<vmem>>, vector<1x256xf32>
    %17 = vector.shape_cast %16 : vector<1x256xf32> to vector<1x256xf32>
    %18 = vector.broadcast %17 : vector<1x256xf32> to vector<8x256xf32>
    %c1 = arith.constant 1 : index
    %c0_15 = arith.constant 0 : index
    %19 = vector.load %arg2[%c1, %c0_15] : memref<2x256xf32, #tpu.memory_space<vmem>>, vector<1x256xf32>
    %20 = vector.shape_cast %19 : vector<1x256xf32> to vector<1x256xf32>
    %21 = vector.broadcast %20 : vector<1x256xf32> to vector<8x256xf32>
    %c0_16 = arith.constant 0 : index
    %c111_17 = arith.constant 111 : index
    %22 = vector.load %arg14[%c0_16, %c111_17] : memref<8x401xf32, #tpu.memory_space<vmem>>, vector<8x256xf32>
    %23 = arith.mulf %22, %18 : vector<8x256xf32>
    %24 = vector.extract_strided_slice %15 {offsets = [0, 0], sizes = [8, 8], strides = [1, 1]} : vector<8x72xbf16> to vector<8x8xbf16>
    %25 = arith.truncf %23 : vector<8x256xf32> to vector<8x256xbf16>
    %cst_18 = arith.constant dense<0.000000e+00> : vector<8x256xf32>
    %26 = tpu.matmul %24, %25, %cst_18 {dimension_numbers = #tpu.dot_dimension_numbers<[1], [0], [0], [1], [0, 0, 1, 1], [], []>} : vector<8x8xbf16>, vector<8x256xbf16>, vector<8x256xf32> -> vector<8x256xf32>
    %c0_19 = arith.constant 0 : index
    %c112 = arith.constant 112 : index
    %27 = vector.load %arg14[%c0_19, %c112] : memref<8x401xf32, #tpu.memory_space<vmem>>, vector<8x256xf32>
    %28 = vector.extract_strided_slice %15 {offsets = [0, 8], sizes = [8, 8], strides = [1, 1]} : vector<8x72xbf16> to vector<8x8xbf16>
    %29 = arith.truncf %27 : vector<8x256xf32> to vector<8x256xbf16>
    %cst_20 = arith.constant dense<0.000000e+00> : vector<8x256xf32>
    %30 = tpu.matmul %28, %29, %cst_20 {dimension_numbers = #tpu.dot_dimension_numbers<[1], [0], [0], [1], [0, 0, 1, 1], [], []>} : vector<8x8xbf16>, vector<8x256xbf16>, vector<8x256xf32> -> vector<8x256xf32>
    %31 = arith.addf %26, %30 : vector<8x256xf32>
    %c0_21 = arith.constant 0 : index
    %c113 = arith.constant 113 : index
    %32 = vector.load %arg14[%c0_21, %c113] : memref<8x401xf32, #tpu.memory_space<vmem>>, vector<8x256xf32>
    %33 = arith.mulf %32, %21 : vector<8x256xf32>
    %34 = vector.extract_strided_slice %15 {offsets = [0, 16], sizes = [8, 8], strides = [1, 1]} : vector<8x72xbf16> to vector<8x8xbf16>
    %35 = arith.truncf %33 : vector<8x256xf32> to vector<8x256xbf16>
    %cst_22 = arith.constant dense<0.000000e+00> : vector<8x256xf32>
    %36 = tpu.matmul %34, %35, %cst_22 {dimension_numbers = #tpu.dot_dimension_numbers<[1], [0], [0], [1], [0, 0, 1, 1], [], []>} : vector<8x8xbf16>, vector<8x256xbf16>, vector<8x256xf32> -> vector<8x256xf32>
    %37 = arith.addf %31, %36 : vector<8x256xf32>
    %c0_23 = arith.constant 0 : index
    %c127 = arith.constant 127 : index
    %38 = vector.load %arg14[%c0_23, %c127] : memref<8x401xf32, #tpu.memory_space<vmem>>, vector<8x256xf32>
    %39 = arith.mulf %38, %18 : vector<8x256xf32>
    %40 = vector.extract_strided_slice %15 {offsets = [0, 24], sizes = [8, 8], strides = [1, 1]} : vector<8x72xbf16> to vector<8x8xbf16>
    %41 = arith.truncf %39 : vector<8x256xf32> to vector<8x256xbf16>
    %cst_24 = arith.constant dense<0.000000e+00> : vector<8x256xf32>
    %42 = tpu.matmul %40, %41, %cst_24 {dimension_numbers = #tpu.dot_dimension_numbers<[1], [0], [0], [1], [0, 0, 1, 1], [], []>} : vector<8x8xbf16>, vector<8x256xbf16>, vector<8x256xf32> -> vector<8x256xf32>
    %43 = arith.addf %37, %42 : vector<8x256xf32>
    %c0_25 = arith.constant 0 : index
    %c128_26 = arith.constant 128 : index
    %44 = vector.load %arg14[%c0_25, %c128_26] : memref<8x401xf32, #tpu.memory_space<vmem>>, vector<8x256xf32>
    %45 = vector.extract_strided_slice %15 {offsets = [0, 32], sizes = [8, 8], strides = [1, 1]} : vector<8x72xbf16> to vector<8x8xbf16>
    %46 = arith.truncf %44 : vector<8x256xf32> to vector<8x256xbf16>
    %cst_27 = arith.constant dense<0.000000e+00> : vector<8x256xf32>
    %47 = tpu.matmul %45, %46, %cst_27 {dimension_numbers = #tpu.dot_dimension_numbers<[1], [0], [0], [1], [0, 0, 1, 1], [], []>} : vector<8x8xbf16>, vector<8x256xbf16>, vector<8x256xf32> -> vector<8x256xf32>
    %48 = arith.addf %43, %47 : vector<8x256xf32>
    %c0_28 = arith.constant 0 : index
    %c129 = arith.constant 129 : index
    %49 = vector.load %arg14[%c0_28, %c129] : memref<8x401xf32, #tpu.memory_space<vmem>>, vector<8x256xf32>
    %50 = arith.mulf %49, %21 : vector<8x256xf32>
    %51 = vector.extract_strided_slice %15 {offsets = [0, 40], sizes = [8, 8], strides = [1, 1]} : vector<8x72xbf16> to vector<8x8xbf16>
    %52 = arith.truncf %50 : vector<8x256xf32> to vector<8x256xbf16>
    %cst_29 = arith.constant dense<0.000000e+00> : vector<8x256xf32>
    %53 = tpu.matmul %51, %52, %cst_29 {dimension_numbers = #tpu.dot_dimension_numbers<[1], [0], [0], [1], [0, 0, 1, 1], [], []>} : vector<8x8xbf16>, vector<8x256xbf16>, vector<8x256xf32> -> vector<8x256xf32>
    %54 = arith.addf %48, %53 : vector<8x256xf32>
    %c0_30 = arith.constant 0 : index
    %c143 = arith.constant 143 : index
    %55 = vector.load %arg14[%c0_30, %c143] : memref<8x401xf32, #tpu.memory_space<vmem>>, vector<8x256xf32>
    %56 = arith.mulf %55, %18 : vector<8x256xf32>
    %57 = vector.extract_strided_slice %15 {offsets = [0, 48], sizes = [8, 8], strides = [1, 1]} : vector<8x72xbf16> to vector<8x8xbf16>
    %58 = arith.truncf %56 : vector<8x256xf32> to vector<8x256xbf16>
    %cst_31 = arith.constant dense<0.000000e+00> : vector<8x256xf32>
    %59 = tpu.matmul %57, %58, %cst_31 {dimension_numbers = #tpu.dot_dimension_numbers<[1], [0], [0], [1], [0, 0, 1, 1], [], []>} : vector<8x8xbf16>, vector<8x256xbf16>, vector<8x256xf32> -> vector<8x256xf32>
    %60 = arith.addf %54, %59 : vector<8x256xf32>
    %c0_32 = arith.constant 0 : index
    %c144 = arith.constant 144 : index
    %61 = vector.load %arg14[%c0_32, %c144] : memref<8x401xf32, #tpu.memory_space<vmem>>, vector<8x256xf32>
    %62 = vector.extract_strided_slice %15 {offsets = [0, 56], sizes = [8, 8], strides = [1, 1]} : vector<8x72xbf16> to vector<8x8xbf16>
    %63 = arith.truncf %61 : vector<8x256xf32> to vector<8x256xbf16>
    %cst_33 = arith.constant dense<0.000000e+00> : vector<8x256xf32>
    %64 = tpu.matmul %62, %63, %cst_33 {dimension_numbers = #tpu.dot_dimension_numbers<[1], [0], [0], [1], [0, 0, 1, 1], [], []>} : vector<8x8xbf16>, vector<8x256xbf16>, vector<8x256xf32> -> vector<8x256xf32>
    %65 = arith.addf %60, %64 : vector<8x256xf32>
    %c0_34 = arith.constant 0 : index
    %c145 = arith.constant 145 : index
    %66 = vector.load %arg14[%c0_34, %c145] : memref<8x401xf32, #tpu.memory_space<vmem>>, vector<8x256xf32>
    %67 = arith.mulf %66, %21 : vector<8x256xf32>
    %68 = vector.extract_strided_slice %15 {offsets = [0, 64], sizes = [8, 8], strides = [1, 1]} : vector<8x72xbf16> to vector<8x8xbf16>
    %69 = arith.truncf %67 : vector<8x256xf32> to vector<8x256xbf16>
    %cst_35 = arith.constant dense<0.000000e+00> : vector<8x256xf32>
    %70 = tpu.matmul %68, %69, %cst_35 {dimension_numbers = #tpu.dot_dimension_numbers<[1], [0], [0], [1], [0, 0, 1, 1], [], []>} : vector<8x8xbf16>, vector<8x256xbf16>, vector<8x256xf32> -> vector<8x256xf32>
    %71 = arith.addf %65, %70 : vector<8x256xf32>
    %c0_36 = arith.constant 0 : index
    %c0_37 = arith.constant 0 : index
    %72 = vector.load %arg6[%c0_36, %c0_37] : memref<8x1xf32, #tpu.memory_space<vmem>>, vector<8x1xf32>
    %73 = vector.broadcast %72 : vector<8x1xf32> to vector<8x256xf32>
    %74 = arith.addf %71, %73 : vector<8x256xf32>
    %cst_38 = arith.constant 0.00999999977 : f32
    %75 = vector.broadcast %cst_38 : f32 to vector<8x256xf32>
    %76 = arith.mulf %75, %74 : vector<8x256xf32>
    %77 = arith.maximumf %74, %76 : vector<8x256xf32>
    %c0_39 = arith.constant 0 : index
    %c0_40 = arith.constant 0 : index
    %78 = vector.load %arg8[%c0_39, %c0_40] : memref<4x8xbf16, #tpu.memory_space<vmem>>, vector<4x8xbf16>
    %79 = arith.truncf %77 : vector<8x256xf32> to vector<8x256xbf16>
    %cst_41 = arith.constant dense<0.000000e+00> : vector<4x256xf32>
    %80 = tpu.matmul %78, %79, %cst_41 {dimension_numbers = #tpu.dot_dimension_numbers<[1], [0], [0], [1], [0, 0, 1, 1], [], []>} : vector<4x8xbf16>, vector<8x256xbf16>, vector<4x256xf32> -> vector<4x256xf32>
    %c0_42 = arith.constant 0 : index
    %c0_43 = arith.constant 0 : index
    %81 = vector.load %arg9[%c0_42, %c0_43] : memref<4x1xf32, #tpu.memory_space<vmem>>, vector<4x1xf32>
    %82 = vector.broadcast %81 : vector<4x1xf32> to vector<4x256xf32>
    %83 = arith.addf %80, %82 : vector<4x256xf32>
    %cst_44 = arith.constant 0.00999999977 : f32
    %84 = vector.broadcast %cst_44 : f32 to vector<4x256xf32>
    %85 = arith.mulf %84, %83 : vector<4x256xf32>
    %86 = arith.maximumf %83, %85 : vector<4x256xf32>
    %cst_45 = arith.constant 0.000000e+00 : f32
    %87 = vector.broadcast %cst_45 : f32 to vector<4x17xf32>
    %c0_46 = arith.constant 0 : index
    %c111_47 = arith.constant 111 : index
    %88 = vector.load %arg14[%c0_46, %c111_47] : memref<8x401xf32, #tpu.memory_space<vmem>>, vector<4x17xf32>
    tpu.vector_store %arg14[%c0_46, %c111_47], %87 {strides = array<i32>} : memref<8x401xf32, #tpu.memory_space<vmem>>, vector<4x17xf32>,
    %c0_48 = arith.constant 0 : index
    %c384_49 = arith.constant 384 : index
    %89 = vector.load %arg14[%c0_48, %c384_49] : memref<8x401xf32, #tpu.memory_space<vmem>>, vector<4x17xf32>
    tpu.vector_store %arg14[%c0_48, %c384_49], %87 {strides = array<i32>} : memref<8x401xf32, #tpu.memory_space<vmem>>, vector<4x17xf32>,
    %c0_50 = arith.constant 0 : index
    %c128_51 = arith.constant 128 : index
    %90 = vector.load %arg14[%c0_50, %c128_51] : memref<8x401xf32, #tpu.memory_space<vmem>>, vector<4x256xf32>
    tpu.vector_store %arg14[%c0_50, %c128_51], %86 {strides = array<i32>} : memref<8x401xf32, #tpu.memory_space<vmem>>, vector<4x256xf32>,
    %c0_52 = arith.constant 0 : index
    %c0_53 = arith.constant 0 : index
    %91 = vector.load %arg10[%c0_52, %c0_53] : memref<4x36xbf16, #tpu.memory_space<vmem>>, vector<4x36xbf16>
    %c0_54 = arith.constant 0 : index
    %c0_55 = arith.constant 0 : index
    %92 = vector.load %arg7[%c0_54, %c0_55] : memref<2x256xf32, #tpu.memory_space<vmem>>, vector<1x256xf32>
    %93 = vector.shape_cast %92 : vector<1x256xf32> to vector<1x256xf32>
    %94 = vector.broadcast %93 : vector<1x256xf32> to vector<4x256xf32>
    %c1_56 = arith.constant 1 : index
    %c0_57 = arith.constant 0 : index
    %95 = vector.load %arg7[%c1_56, %c0_57] : memref<2x256xf32, #tpu.memory_space<vmem>>, vector<1x256xf32>
    %96 = vector.shape_cast %95 : vector<1x256xf32> to vector<1x256xf32>
    %97 = vector.broadcast %96 : vector<1x256xf32> to vector<4x256xf32>
    %c0_58 = arith.constant 0 : index
    %c111_59 = arith.constant 111 : index
    %98 = vector.load %arg14[%c0_58, %c111_59] : memref<8x401xf32, #tpu.memory_space<vmem>>, vector<4x256xf32>
    %99 = arith.mulf %98, %94 : vector<4x256xf32>
    %100 = vector.extract_strided_slice %91 {offsets = [0, 0], sizes = [4, 4], strides = [1, 1]} : vector<4x36xbf16> to vector<4x4xbf16>
    %101 = arith.truncf %99 : vector<4x256xf32> to vector<4x256xbf16>
    %cst_60 = arith.constant dense<0.000000e+00> : vector<4x256xf32>
    %102 = tpu.matmul %100, %101, %cst_60 {dimension_numbers = #tpu.dot_dimension_numbers<[1], [0], [0], [1], [0, 0, 1, 1], [], []>} : vector<4x4xbf16>, vector<4x256xbf16>, vector<4x256xf32> -> vector<4x256xf32>
    %c0_61 = arith.constant 0 : index
    %c112_62 = arith.constant 112 : index
    %103 = vector.load %arg14[%c0_61, %c112_62] : memref<8x401xf32, #tpu.memory_space<vmem>>, vector<4x256xf32>
    %104 = vector.extract_strided_slice %91 {offsets = [0, 4], sizes = [4, 4], strides = [1, 1]} : vector<4x36xbf16> to vector<4x4xbf16>
    %105 = arith.truncf %103 : vector<4x256xf32> to vector<4x256xbf16>
    %cst_63 = arith.constant dense<0.000000e+00> : vector<4x256xf32>
    %106 = tpu.matmul %104, %105, %cst_63 {dimension_numbers = #tpu.dot_dimension_numbers<[1], [0], [0], [1], [0, 0, 1, 1], [], []>} : vector<4x4xbf16>, vector<4x256xbf16>, vector<4x256xf32> -> vector<4x256xf32>
    %107 = arith.addf %102, %106 : vector<4x256xf32>
    %c0_64 = arith.constant 0 : index
    %c113_65 = arith.constant 113 : index
    %108 = vector.load %arg14[%c0_64, %c113_65] : memref<8x401xf32, #tpu.memory_space<vmem>>, vector<4x256xf32>
    %109 = arith.mulf %108, %97 : vector<4x256xf32>
    %110 = vector.extract_strided_slice %91 {offsets = [0, 8], sizes = [4, 4], strides = [1, 1]} : vector<4x36xbf16> to vector<4x4xbf16>
    %111 = arith.truncf %109 : vector<4x256xf32> to vector<4x256xbf16>
    %cst_66 = arith.constant dense<0.000000e+00> : vector<4x256xf32>
    %112 = tpu.matmul %110, %111, %cst_66 {dimension_numbers = #tpu.dot_dimension_numbers<[1], [0], [0], [1], [0, 0, 1, 1], [], []>} : vector<4x4xbf16>, vector<4x256xbf16>, vector<4x256xf32> -> vector<4x256xf32>
    %113 = arith.addf %107, %112 : vector<4x256xf32>
    %c0_67 = arith.constant 0 : index
    %c127_68 = arith.constant 127 : index
    %114 = vector.load %arg14[%c0_67, %c127_68] : memref<8x401xf32, #tpu.memory_space<vmem>>, vector<4x256xf32>
    %115 = arith.mulf %114, %94 : vector<4x256xf32>
    %116 = vector.extract_strided_slice %91 {offsets = [0, 12], sizes = [4, 4], strides = [1, 1]} : vector<4x36xbf16> to vector<4x4xbf16>
    %117 = arith.truncf %115 : vector<4x256xf32> to vector<4x256xbf16>
    %cst_69 = arith.constant dense<0.000000e+00> : vector<4x256xf32>
    %118 = tpu.matmul %116, %117, %cst_69 {dimension_numbers = #tpu.dot_dimension_numbers<[1], [0], [0], [1], [0, 0, 1, 1], [], []>} : vector<4x4xbf16>, vector<4x256xbf16>, vector<4x256xf32> -> vector<4x256xf32>
    %119 = arith.addf %113, %118 : vector<4x256xf32>
    %c0_70 = arith.constant 0 : index
    %c128_71 = arith.constant 128 : index
    %120 = vector.load %arg14[%c0_70, %c128_71] : memref<8x401xf32, #tpu.memory_space<vmem>>, vector<4x256xf32>
    %121 = vector.extract_strided_slice %91 {offsets = [0, 16], sizes = [4, 4], strides = [1, 1]} : vector<4x36xbf16> to vector<4x4xbf16>
    %122 = arith.truncf %120 : vector<4x256xf32> to vector<4x256xbf16>
    %cst_72 = arith.constant dense<0.000000e+00> : vector<4x256xf32>
    %123 = tpu.matmul %121, %122, %cst_72 {dimension_numbers = #tpu.dot_dimension_numbers<[1], [0], [0], [1], [0, 0, 1, 1], [], []>} : vector<4x4xbf16>, vector<4x256xbf16>, vector<4x256xf32> -> vector<4x256xf32>
    %124 = arith.addf %119, %123 : vector<4x256xf32>
    %c0_73 = arith.constant 0 : index
    %c129_74 = arith.constant 129 : index
    %125 = vector.load %arg14[%c0_73, %c129_74] : memref<8x401xf32, #tpu.memory_space<vmem>>, vector<4x256xf32>
    %126 = arith.mulf %125, %97 : vector<4x256xf32>
    %127 = vector.extract_strided_slice %91 {offsets = [0, 20], sizes = [4, 4], strides = [1, 1]} : vector<4x36xbf16> to vector<4x4xbf16>
    %128 = arith.truncf %126 : vector<4x256xf32> to vector<4x256xbf16>
    %cst_75 = arith.constant dense<0.000000e+00> : vector<4x256xf32>
    %129 = tpu.matmul %127, %128, %cst_75 {dimension_numbers = #tpu.dot_dimension_numbers<[1], [0], [0], [1], [0, 0, 1, 1], [], []>} : vector<4x4xbf16>, vector<4x256xbf16>, vector<4x256xf32> -> vector<4x256xf32>
    %130 = arith.addf %124, %129 : vector<4x256xf32>
    %c0_76 = arith.constant 0 : index
    %c143_77 = arith.constant 143 : index
    %131 = vector.load %arg14[%c0_76, %c143_77] : memref<8x401xf32, #tpu.memory_space<vmem>>, vector<4x256xf32>
    %132 = arith.mulf %131, %94 : vector<4x256xf32>
    %133 = vector.extract_strided_slice %91 {offsets = [0, 24], sizes = [4, 4], strides = [1, 1]} : vector<4x36xbf16> to vector<4x4xbf16>
    %134 = arith.truncf %132 : vector<4x256xf32> to vector<4x256xbf16>
    %cst_78 = arith.constant dense<0.000000e+00> : vector<4x256xf32>
    %135 = tpu.matmul %133, %134, %cst_78 {dimension_numbers = #tpu.dot_dimension_numbers<[1], [0], [0], [1], [0, 0, 1, 1], [], []>} : vector<4x4xbf16>, vector<4x256xbf16>, vector<4x256xf32> -> vector<4x256xf32>
    %136 = arith.addf %130, %135 : vector<4x256xf32>
    %c0_79 = arith.constant 0 : index
    %c144_80 = arith.constant 144 : index
    %137 = vector.load %arg14[%c0_79, %c144_80] : memref<8x401xf32, #tpu.memory_space<vmem>>, vector<4x256xf32>
    %138 = vector.extract_strided_slice %91 {offsets = [0, 28], sizes = [4, 4], strides = [1, 1]} : vector<4x36xbf16> to vector<4x4xbf16>
    %139 = arith.truncf %137 : vector<4x256xf32> to vector<4x256xbf16>
    %cst_81 = arith.constant dense<0.000000e+00> : vector<4x256xf32>
    %140 = tpu.matmul %138, %139, %cst_81 {dimension_numbers = #tpu.dot_dimension_numbers<[1], [0], [0], [1], [0, 0, 1, 1], [], []>} : vector<4x4xbf16>, vector<4x256xbf16>, vector<4x256xf32> -> vector<4x256xf32>
    %141 = arith.addf %136, %140 : vector<4x256xf32>
    %c0_82 = arith.constant 0 : index
    %c145_83 = arith.constant 145 : index
    %142 = vector.load %arg14[%c0_82, %c145_83] : memref<8x401xf32, #tpu.memory_space<vmem>>, vector<4x256xf32>
    %143 = arith.mulf %142, %97 : vector<4x256xf32>
    %144 = vector.extract_strided_slice %91 {offsets = [0, 32], sizes = [4, 4], strides = [1, 1]} : vector<4x36xbf16> to vector<4x4xbf16>
    %145 = arith.truncf %143 : vector<4x256xf32> to vector<4x256xbf16>
    %cst_84 = arith.constant dense<0.000000e+00> : vector<4x256xf32>
    %146 = tpu.matmul %144, %145, %cst_84 {dimension_numbers = #tpu.dot_dimension_numbers<[1], [0], [0], [1], [0, 0, 1, 1], [], []>} : vector<4x4xbf16>, vector<4x256xbf16>, vector<4x256xf32> -> vector<4x256xf32>
    %147 = arith.addf %141, %146 : vector<4x256xf32>
    %c0_85 = arith.constant 0 : index
    %c0_86 = arith.constant 0 : index
    %148 = vector.load %arg11[%c0_85, %c0_86] : memref<4x1xf32, #tpu.memory_space<vmem>>, vector<4x1xf32>
    %149 = vector.broadcast %148 : vector<4x1xf32> to vector<4x256xf32>
    %150 = arith.addf %147, %149 : vector<4x256xf32>
    %cst_87 = arith.constant 0.00999999977 : f32
    %151 = vector.broadcast %cst_87 : f32 to vector<4x256xf32>
    %152 = arith.mulf %151, %150 : vector<4x256xf32>
    %153 = arith.maximumf %150, %152 : vector<4x256xf32>
    %c0_88 = arith.constant 0 : index
    %c0_89 = arith.constant 0 : index
    %154 = vector.load %arg12[%c0_88, %c0_89] : memref<16x32xf32, #tpu.memory_space<vmem>>, vector<16x32xf32>
    %155 = vector.extract_strided_slice %153 {offsets = [0, 0], sizes = [4, 16], strides = [1, 1]} : vector<4x256xf32> to vector<4x16xf32>
    %cst_90 = arith.constant dense<0.000000e+00> : vector<4x32xf32>
    %156 = tpu.matmul %155, %154, %cst_90 {dimension_numbers = #tpu.dot_dimension_numbers<[1], [0], [0], [1], [0, 0, 1, 1], [], []>} : vector<4x16xf32>, vector<16x32xf32>, vector<4x32xf32> -> vector<4x32xf32>
    %157 = vector.extract_strided_slice %153 {offsets = [0, 16], sizes = [4, 16], strides = [1, 1]} : vector<4x256xf32> to vector<4x16xf32>
    %cst_91 = arith.constant dense<0.000000e+00> : vector<4x32xf32>
    %158 = tpu.matmul %157, %154, %cst_91 {dimension_numbers = #tpu.dot_dimension_numbers<[1], [0], [0], [1], [0, 0, 1, 1], [], []>} : vector<4x16xf32>, vector<16x32xf32>, vector<4x32xf32> -> vector<4x32xf32>
    %cst_92 = arith.constant 2.500000e-01 : f32
    %159 = vector.broadcast %cst_92 : f32 to vector<4x32xf32>
    %160 = arith.mulf %159, %156 : vector<4x32xf32>
    %cst_93 = arith.constant 7.500000e-01 : f32
    %161 = vector.broadcast %cst_93 : f32 to vector<4x32xf32>
    %162 = arith.mulf %161, %156 : vector<4x32xf32>
    %163 = arith.addf %160, %162 : vector<4x32xf32>
    %cst_94 = arith.constant 7.500000e-01 : f32
    %164 = vector.broadcast %cst_94 : f32 to vector<4x32xf32>
    %165 = arith.mulf %164, %156 : vector<4x32xf32>
    %cst_95 = arith.constant 2.500000e-01 : f32
    %166 = vector.broadcast %cst_95 : f32 to vector<4x32xf32>
    %167 = arith.mulf %166, %158 : vector<4x32xf32>
    %168 = arith.addf %165, %167 : vector<4x32xf32>
    %c0_96 = arith.constant 0 : index
    %c0_97 = arith.constant 0 : index
    %c0_98 = arith.constant 0 : index
    %169 = vector.load %arg13[%c0_96, %c0_97, %c0_98] : memref<1x4x1024xf32, #tpu.memory_space<vmem>>, vector<1x4x32xf32>
    %170 = vector.shape_cast %169 : vector<1x4x32xf32> to vector<4x32xf32>
    %171 = vector.shape_cast %163 : vector<4x32xf32> to vector<1x4x32xf32>
    tpu.vector_store %arg13[%c0_96, %c0_97, %c0_98], %171 {strides = array<i32>} : memref<1x4x1024xf32, #tpu.memory_space<vmem>>, vector<1x4x32xf32>,
    %c0_99 = arith.constant 0 : index
    %c0_100 = arith.constant 0 : index
    %c32 = arith.constant 32 : index
    %172 = vector.load %arg13[%c0_99, %c0_100, %c32] : memref<1x4x1024xf32, #tpu.memory_space<vmem>>, vector<1x4x32xf32>
    %173 = vector.shape_cast %172 : vector<1x4x32xf32> to vector<4x32xf32>
    %174 = vector.shape_cast %168 : vector<4x32xf32> to vector<1x4x32xf32>
    tpu.vector_store %arg13[%c0_99, %c0_100, %c32], %174 {strides = array<i32>} : memref<1x4x1024xf32, #tpu.memory_space<vmem>>, vector<1x4x32xf32>,
    %175 = vector.extract_strided_slice %153 {offsets = [0, 32], sizes = [4, 16], strides = [1, 1]} : vector<4x256xf32> to vector<4x16xf32>
    %cst_101 = arith.constant dense<0.000000e+00> : vector<4x32xf32>
    %176 = tpu.matmul %175, %154, %cst_101 {dimension_numbers = #tpu.dot_dimension_numbers<[1], [0], [0], [1], [0, 0, 1, 1], [], []>} : vector<4x16xf32>, vector<16x32xf32>, vector<4x32xf32> -> vector<4x32xf32>
    %cst_102 = arith.constant 2.500000e-01 : f32
    %177 = vector.broadcast %cst_102 : f32 to vector<4x32xf32>
    %178 = arith.mulf %177, %156 : vector<4x32xf32>
    %cst_103 = arith.constant 7.500000e-01 : f32
    %179 = vector.broadcast %cst_103 : f32 to vector<4x32xf32>
    %180 = arith.mulf %179, %158 : vector<4x32xf32>
    %181 = arith.addf %178, %180 : vector<4x32xf32>
    %cst_104 = arith.constant 7.500000e-01 : f32
    %182 = vector.broadcast %cst_104 : f32 to vector<4x32xf32>
    %183 = arith.mulf %182, %158 : vector<4x32xf32>
    %cst_105 = arith.constant 2.500000e-01 : f32
    %184 = vector.broadcast %cst_105 : f32 to vector<4x32xf32>
    %185 = arith.mulf %184, %176 : vector<4x32xf32>
    %186 = arith.addf %183, %185 : vector<4x32xf32>
    %c0_106 = arith.constant 0 : index
    %c0_107 = arith.constant 0 : index
    %c64 = arith.constant 64 : index
    %187 = vector.load %arg13[%c0_106, %c0_107, %c64] : memref<1x4x1024xf32, #tpu.memory_space<vmem>>, vector<1x4x32xf32>
    %188 = vector.shape_cast %187 : vector<1x4x32xf32> to vector<4x32xf32>
    %189 = vector.shape_cast %181 : vector<4x32xf32> to vector<1x4x32xf32>
    tpu.vector_store %arg13[%c0_106, %c0_107, %c64], %189 {strides = array<i32>} : memref<1x4x1024xf32, #tpu.memory_space<vmem>>, vector<1x4x32xf32>,
    %c0_108 = arith.constant 0 : index
    %c0_109 = arith.constant 0 : index
    %c96 = arith.constant 96 : index
    %190 = vector.load %arg13[%c0_108, %c0_109, %c96] : memref<1x4x1024xf32, #tpu.memory_space<vmem>>, vector<1x4x32xf32>
    %191 = vector.shape_cast %190 : vector<1x4x32xf32> to vector<4x32xf32>
    %192 = vector.shape_cast %186 : vector<4x32xf32> to vector<1x4x32xf32>
    tpu.vector_store %arg13[%c0_108, %c0_109, %c96], %192 {strides = array<i32>} : memref<1x4x1024xf32, #tpu.memory_space<vmem>>, vector<1x4x32xf32>,
    %193 = vector.extract_strided_slice %153 {offsets = [0, 48], sizes = [4, 16], strides = [1, 1]} : vector<4x256xf32> to vector<4x16xf32>
    %cst_110 = arith.constant dense<0.000000e+00> : vector<4x32xf32>
    %194 = tpu.matmul %193, %154, %cst_110 {dimension_numbers = #tpu.dot_dimension_numbers<[1], [0], [0], [1], [0, 0, 1, 1], [], []>} : vector<4x16xf32>, vector<16x32xf32>, vector<4x32xf32> -> vector<4x32xf32>
    %cst_111 = arith.constant 2.500000e-01 : f32
    %195 = vector.broadcast %cst_111 : f32 to vector<4x32xf32>
    %196 = arith.mulf %195, %158 : vector<4x32xf32>
    %cst_112 = arith.constant 7.500000e-01 : f32
    %197 = vector.broadcast %cst_112 : f32 to vector<4x32xf32>
    %198 = arith.mulf %197, %176 : vector<4x32xf32>
    %199 = arith.addf %196, %198 : vector<4x32xf32>
    %cst_113 = arith.constant 7.500000e-01 : f32
    %200 = vector.broadcast %cst_113 : f32 to vector<4x32xf32>
    %201 = arith.mulf %200, %176 : vector<4x32xf32>
    %cst_114 = arith.constant 2.500000e-01 : f32
    %202 = vector.broadcast %cst_114 : f32 to vector<4x32xf32>
    %203 = arith.mulf %202, %194 : vector<4x32xf32>
    %204 = arith.addf %201, %203 : vector<4x32xf32>
    %c0_115 = arith.constant 0 : index
    %c0_116 = arith.constant 0 : index
    %c128_117 = arith.constant 128 : index
    %205 = vector.load %arg13[%c0_115, %c0_116, %c128_117] : memref<1x4x1024xf32, #tpu.memory_space<vmem>>, vector<1x4x32xf32>
    %206 = vector.shape_cast %205 : vector<1x4x32xf32> to vector<4x32xf32>
    %207 = vector.shape_cast %199 : vector<4x32xf32> to vector<1x4x32xf32>
    tpu.vector_store %arg13[%c0_115, %c0_116, %c128_117], %207 {strides = array<i32>} : memref<1x4x1024xf32, #tpu.memory_space<vmem>>, vector<1x4x32xf32>,
    %c0_118 = arith.constant 0 : index
    %c0_119 = arith.constant 0 : index
    %c160 = arith.constant 160 : index
    %208 = vector.load %arg13[%c0_118, %c0_119, %c160] : memref<1x4x1024xf32, #tpu.memory_space<vmem>>, vector<1x4x32xf32>
    %209 = vector.shape_cast %208 : vector<1x4x32xf32> to vector<4x32xf32>
    %210 = vector.shape_cast %204 : vector<4x32xf32> to vector<1x4x32xf32>
    tpu.vector_store %arg13[%c0_118, %c0_119, %c160], %210 {strides = array<i32>} : memref<1x4x1024xf32, #tpu.memory_space<vmem>>, vector<1x4x32xf32>,
    %211 = vector.extract_strided_slice %153 {offsets = [0, 64], sizes = [4, 16], strides = [1, 1]} : vector<4x256xf32> to vector<4x16xf32>
    %cst_120 = arith.constant dense<0.000000e+00> : vector<4x32xf32>
    %212 = tpu.matmul %211, %154, %cst_120 {dimension_numbers = #tpu.dot_dimension_numbers<[1], [0], [0], [1], [0, 0, 1, 1], [], []>} : vector<4x16xf32>, vector<16x32xf32>, vector<4x32xf32> -> vector<4x32xf32>
    %cst_121 = arith.constant 2.500000e-01 : f32
    %213 = vector.broadcast %cst_121 : f32 to vector<4x32xf32>
    %214 = arith.mulf %213, %176 : vector<4x32xf32>
    %cst_122 = arith.constant 7.500000e-01 : f32
    %215 = vector.broadcast %cst_122 : f32 to vector<4x32xf32>
    %216 = arith.mulf %215, %194 : vector<4x32xf32>
    %217 = arith.addf %214, %216 : vector<4x32xf32>
    %cst_123 = arith.constant 7.500000e-01 : f32
    %218 = vector.broadcast %cst_123 : f32 to vector<4x32xf32>
    %219 = arith.mulf %218, %194 : vector<4x32xf32>
    %cst_124 = arith.constant 2.500000e-01 : f32
    %220 = vector.broadcast %cst_124 : f32 to vector<4x32xf32>
    %221 = arith.mulf %220, %212 : vector<4x32xf32>
    %222 = arith.addf %219, %221 : vector<4x32xf32>
    %c0_125 = arith.constant 0 : index
    %c0_126 = arith.constant 0 : index
    %c192 = arith.constant 192 : index
    %223 = vector.load %arg13[%c0_125, %c0_126, %c192] : memref<1x4x1024xf32, #tpu.memory_space<vmem>>, vector<1x4x32xf32>
    %224 = vector.shape_cast %223 : vector<1x4x32xf32> to vector<4x32xf32>
    %225 = vector.shape_cast %217 : vector<4x32xf32> to vector<1x4x32xf32>
    tpu.vector_store %arg13[%c0_125, %c0_126, %c192], %225 {strides = array<i32>} : memref<1x4x1024xf32, #tpu.memory_space<vmem>>, vector<1x4x32xf32>,
    %c0_127 = arith.constant 0 : index
    %c0_128 = arith.constant 0 : index
    %c224 = arith.constant 224 : index
    %226 = vector.load %arg13[%c0_127, %c0_128, %c224] : memref<1x4x1024xf32, #tpu.memory_space<vmem>>, vector<1x4x32xf32>
    %227 = vector.shape_cast %226 : vector<1x4x32xf32> to vector<4x32xf32>
    %228 = vector.shape_cast %222 : vector<4x32xf32> to vector<1x4x32xf32>
    tpu.vector_store %arg13[%c0_127, %c0_128, %c224], %228 {strides = array<i32>} : memref<1x4x1024xf32, #tpu.memory_space<vmem>>, vector<1x4x32xf32>,
    %229 = vector.extract_strided_slice %153 {offsets = [0, 80], sizes = [4, 16], strides = [1, 1]} : vector<4x256xf32> to vector<4x16xf32>
    %cst_129 = arith.constant dense<0.000000e+00> : vector<4x32xf32>
    %230 = tpu.matmul %229, %154, %cst_129 {dimension_numbers = #tpu.dot_dimension_numbers<[1], [0], [0], [1], [0, 0, 1, 1], [], []>} : vector<4x16xf32>, vector<16x32xf32>, vector<4x32xf32> -> vector<4x32xf32>
    %cst_130 = arith.constant 2.500000e-01 : f32
    %231 = vector.broadcast %cst_130 : f32 to vector<4x32xf32>
    %232 = arith.mulf %231, %194 : vector<4x32xf32>
    %cst_131 = arith.constant 7.500000e-01 : f32
    %233 = vector.broadcast %cst_131 : f32 to vector<4x32xf32>
    %234 = arith.mulf %233, %212 : vector<4x32xf32>
    %235 = arith.addf %232, %234 : vector<4x32xf32>
    %cst_132 = arith.constant 7.500000e-01 : f32
    %236 = vector.broadcast %cst_132 : f32 to vector<4x32xf32>
    %237 = arith.mulf %236, %212 : vector<4x32xf32>
    %cst_133 = arith.constant 2.500000e-01 : f32
    %238 = vector.broadcast %cst_133 : f32 to vector<4x32xf32>
    %239 = arith.mulf %238, %230 : vector<4x32xf32>
    %240 = arith.addf %237, %239 : vector<4x32xf32>
    %c0_134 = arith.constant 0 : index
    %c0_135 = arith.constant 0 : index
    %c256 = arith.constant 256 : index
    %241 = vector.load %arg13[%c0_134, %c0_135, %c256] : memref<1x4x1024xf32, #tpu.memory_space<vmem>>, vector<1x4x32xf32>
    %242 = vector.shape_cast %241 : vector<1x4x32xf32> to vector<4x32xf32>
    %243 = vector.shape_cast %235 : vector<4x32xf32> to vector<1x4x32xf32>
    tpu.vector_store %arg13[%c0_134, %c0_135, %c256], %243 {strides = array<i32>} : memref<1x4x1024xf32, #tpu.memory_space<vmem>>, vector<1x4x32xf32>,
    %c0_136 = arith.constant 0 : index
    %c0_137 = arith.constant 0 : index
    %c288 = arith.constant 288 : index
    %244 = vector.load %arg13[%c0_136, %c0_137, %c288] : memref<1x4x1024xf32, #tpu.memory_space<vmem>>, vector<1x4x32xf32>
    %245 = vector.shape_cast %244 : vector<1x4x32xf32> to vector<4x32xf32>
    %246 = vector.shape_cast %240 : vector<4x32xf32> to vector<1x4x32xf32>
    tpu.vector_store %arg13[%c0_136, %c0_137, %c288], %246 {strides = array<i32>} : memref<1x4x1024xf32, #tpu.memory_space<vmem>>, vector<1x4x32xf32>,
    %247 = vector.extract_strided_slice %153 {offsets = [0, 96], sizes = [4, 16], strides = [1, 1]} : vector<4x256xf32> to vector<4x16xf32>
    %cst_138 = arith.constant dense<0.000000e+00> : vector<4x32xf32>
    %248 = tpu.matmul %247, %154, %cst_138 {dimension_numbers = #tpu.dot_dimension_numbers<[1], [0], [0], [1], [0, 0, 1, 1], [], []>} : vector<4x16xf32>, vector<16x32xf32>, vector<4x32xf32> -> vector<4x32xf32>
    %cst_139 = arith.constant 2.500000e-01 : f32
    %249 = vector.broadcast %cst_139 : f32 to vector<4x32xf32>
    %250 = arith.mulf %249, %212 : vector<4x32xf32>
    %cst_140 = arith.constant 7.500000e-01 : f32
    %251 = vector.broadcast %cst_140 : f32 to vector<4x32xf32>
    %252 = arith.mulf %251, %230 : vector<4x32xf32>
    %253 = arith.addf %250, %252 : vector<4x32xf32>
    %cst_141 = arith.constant 7.500000e-01 : f32
    %254 = vector.broadcast %cst_141 : f32 to vector<4x32xf32>
    %255 = arith.mulf %254, %230 : vector<4x32xf32>
    %cst_142 = arith.constant 2.500000e-01 : f32
    %256 = vector.broadcast %cst_142 : f32 to vector<4x32xf32>
    %257 = arith.mulf %256, %248 : vector<4x32xf32>
    %258 = arith.addf %255, %257 : vector<4x32xf32>
    %c0_143 = arith.constant 0 : index
    %c0_144 = arith.constant 0 : index
    %c320 = arith.constant 320 : index
    %259 = vector.load %arg13[%c0_143, %c0_144, %c320] : memref<1x4x1024xf32, #tpu.memory_space<vmem>>, vector<1x4x32xf32>
    %260 = vector.shape_cast %259 : vector<1x4x32xf32> to vector<4x32xf32>
    %261 = vector.shape_cast %253 : vector<4x32xf32> to vector<1x4x32xf32>
    tpu.vector_store %arg13[%c0_143, %c0_144, %c320], %261 {strides = array<i32>} : memref<1x4x1024xf32, #tpu.memory_space<vmem>>, vector<1x4x32xf32>,
    %c0_145 = arith.constant 0 : index
    %c0_146 = arith.constant 0 : index
    %c352 = arith.constant 352 : index
    %262 = vector.load %arg13[%c0_145, %c0_146, %c352] : memref<1x4x1024xf32, #tpu.memory_space<vmem>>, vector<1x4x32xf32>
    %263 = vector.shape_cast %262 : vector<1x4x32xf32> to vector<4x32xf32>
    %264 = vector.shape_cast %258 : vector<4x32xf32> to vector<1x4x32xf32>
    tpu.vector_store %arg13[%c0_145, %c0_146, %c352], %264 {strides = array<i32>} : memref<1x4x1024xf32, #tpu.memory_space<vmem>>, vector<1x4x32xf32>,
    %265 = vector.extract_strided_slice %153 {offsets = [0, 112], sizes = [4, 16], strides = [1, 1]} : vector<4x256xf32> to vector<4x16xf32>
    %cst_147 = arith.constant dense<0.000000e+00> : vector<4x32xf32>
    %266 = tpu.matmul %265, %154, %cst_147 {dimension_numbers = #tpu.dot_dimension_numbers<[1], [0], [0], [1], [0, 0, 1, 1], [], []>} : vector<4x16xf32>, vector<16x32xf32>, vector<4x32xf32> -> vector<4x32xf32>
    %cst_148 = arith.constant 2.500000e-01 : f32
    %267 = vector.broadcast %cst_148 : f32 to vector<4x32xf32>
    %268 = arith.mulf %267, %230 : vector<4x32xf32>
    %cst_149 = arith.constant 7.500000e-01 : f32
    %269 = vector.broadcast %cst_149 : f32 to vector<4x32xf32>
    %270 = arith.mulf %269, %248 : vector<4x32xf32>
    %271 = arith.addf %268, %270 : vector<4x32xf32>
    %cst_150 = arith.constant 7.500000e-01 : f32
    %272 = vector.broadcast %cst_150 : f32 to vector<4x32xf32>
    %273 = arith.mulf %272, %248 : vector<4x32xf32>
    %cst_151 = arith.constant 2.500000e-01 : f32
    %274 = vector.broadcast %cst_151 : f32 to vector<4x32xf32>
    %275 = arith.mulf %274, %266 : vector<4x32xf32>
    %276 = arith.addf %273, %275 : vector<4x32xf32>
    %c0_152 = arith.constant 0 : index
    %c0_153 = arith.constant 0 : index
    %c384_154 = arith.constant 384 : index
    %277 = vector.load %arg13[%c0_152, %c0_153, %c384_154] : memref<1x4x1024xf32, #tpu.memory_space<vmem>>, vector<1x4x32xf32>
    %278 = vector.shape_cast %277 : vector<1x4x32xf32> to vector<4x32xf32>
    %279 = vector.shape_cast %271 : vector<4x32xf32> to vector<1x4x32xf32>
    tpu.vector_store %arg13[%c0_152, %c0_153, %c384_154], %279 {strides = array<i32>} : memref<1x4x1024xf32, #tpu.memory_space<vmem>>, vector<1x4x32xf32>,
    %c0_155 = arith.constant 0 : index
    %c0_156 = arith.constant 0 : index
    %c416 = arith.constant 416 : index
    %280 = vector.load %arg13[%c0_155, %c0_156, %c416] : memref<1x4x1024xf32, #tpu.memory_space<vmem>>, vector<1x4x32xf32>
    %281 = vector.shape_cast %280 : vector<1x4x32xf32> to vector<4x32xf32>
    %282 = vector.shape_cast %276 : vector<4x32xf32> to vector<1x4x32xf32>
    tpu.vector_store %arg13[%c0_155, %c0_156, %c416], %282 {strides = array<i32>} : memref<1x4x1024xf32, #tpu.memory_space<vmem>>, vector<1x4x32xf32>,
    %283 = vector.extract_strided_slice %153 {offsets = [0, 128], sizes = [4, 16], strides = [1, 1]} : vector<4x256xf32> to vector<4x16xf32>
    %cst_157 = arith.constant dense<0.000000e+00> : vector<4x32xf32>
    %284 = tpu.matmul %283, %154, %cst_157 {dimension_numbers = #tpu.dot_dimension_numbers<[1], [0], [0], [1], [0, 0, 1, 1], [], []>} : vector<4x16xf32>, vector<16x32xf32>, vector<4x32xf32> -> vector<4x32xf32>
    %cst_158 = arith.constant 2.500000e-01 : f32
    %285 = vector.broadcast %cst_158 : f32 to vector<4x32xf32>
    %286 = arith.mulf %285, %248 : vector<4x32xf32>
    %cst_159 = arith.constant 7.500000e-01 : f32
    %287 = vector.broadcast %cst_159 : f32 to vector<4x32xf32>
    %288 = arith.mulf %287, %266 : vector<4x32xf32>
    %289 = arith.addf %286, %288 : vector<4x32xf32>
    %cst_160 = arith.constant 7.500000e-01 : f32
    %290 = vector.broadcast %cst_160 : f32 to vector<4x32xf32>
    %291 = arith.mulf %290, %266 : vector<4x32xf32>
    %cst_161 = arith.constant 2.500000e-01 : f32
    %292 = vector.broadcast %cst_161 : f32 to vector<4x32xf32>
    %293 = arith.mulf %292, %284 : vector<4x32xf32>
    %294 = arith.addf %291, %293 : vector<4x32xf32>
    %c0_162 = arith.constant 0 : index
    %c0_163 = arith.constant 0 : index
    %c448 = arith.constant 448 : index
    %295 = vector.load %arg13[%c0_162, %c0_163, %c448] : memref<1x4x1024xf32, #tpu.memory_space<vmem>>, vector<1x4x32xf32>
    %296 = vector.shape_cast %295 : vector<1x4x32xf32> to vector<4x32xf32>
    %297 = vector.shape_cast %289 : vector<4x32xf32> to vector<1x4x32xf32>
    tpu.vector_store %arg13[%c0_162, %c0_163, %c448], %297 {strides = array<i32>} : memref<1x4x1024xf32, #tpu.memory_space<vmem>>, vector<1x4x32xf32>,
    %c0_164 = arith.constant 0 : index
    %c0_165 = arith.constant 0 : index
    %c480 = arith.constant 480 : index
    %298 = vector.load %arg13[%c0_164, %c0_165, %c480] : memref<1x4x1024xf32, #tpu.memory_space<vmem>>, vector<1x4x32xf32>
    %299 = vector.shape_cast %298 : vector<1x4x32xf32> to vector<4x32xf32>
    %300 = vector.shape_cast %294 : vector<4x32xf32> to vector<1x4x32xf32>
    tpu.vector_store %arg13[%c0_164, %c0_165, %c480], %300 {strides = array<i32>} : memref<1x4x1024xf32, #tpu.memory_space<vmem>>, vector<1x4x32xf32>,
    %301 = vector.extract_strided_slice %153 {offsets = [0, 144], sizes = [4, 16], strides = [1, 1]} : vector<4x256xf32> to vector<4x16xf32>
    %cst_166 = arith.constant dense<0.000000e+00> : vector<4x32xf32>
    %302 = tpu.matmul %301, %154, %cst_166 {dimension_numbers = #tpu.dot_dimension_numbers<[1], [0], [0], [1], [0, 0, 1, 1], [], []>} : vector<4x16xf32>, vector<16x32xf32>, vector<4x32xf32> -> vector<4x32xf32>
    %cst_167 = arith.constant 2.500000e-01 : f32
    %303 = vector.broadcast %cst_167 : f32 to vector<4x32xf32>
    %304 = arith.mulf %303, %266 : vector<4x32xf32>
    %cst_168 = arith.constant 7.500000e-01 : f32
    %305 = vector.broadcast %cst_168 : f32 to vector<4x32xf32>
    %306 = arith.mulf %305, %284 : vector<4x32xf32>
    %307 = arith.addf %304, %306 : vector<4x32xf32>
    %cst_169 = arith.constant 7.500000e-01 : f32
    %308 = vector.broadcast %cst_169 : f32 to vector<4x32xf32>
    %309 = arith.mulf %308, %284 : vector<4x32xf32>
    %cst_170 = arith.constant 2.500000e-01 : f32
    %310 = vector.broadcast %cst_170 : f32 to vector<4x32xf32>
    %311 = arith.mulf %310, %302 : vector<4x32xf32>
    %312 = arith.addf %309, %311 : vector<4x32xf32>
    %c0_171 = arith.constant 0 : index
    %c0_172 = arith.constant 0 : index
    %c512 = arith.constant 512 : index
    %313 = vector.load %arg13[%c0_171, %c0_172, %c512] : memref<1x4x1024xf32, #tpu.memory_space<vmem>>, vector<1x4x32xf32>
    %314 = vector.shape_cast %313 : vector<1x4x32xf32> to vector<4x32xf32>
    %315 = vector.shape_cast %307 : vector<4x32xf32> to vector<1x4x32xf32>
    tpu.vector_store %arg13[%c0_171, %c0_172, %c512], %315 {strides = array<i32>} : memref<1x4x1024xf32, #tpu.memory_space<vmem>>, vector<1x4x32xf32>,
    %c0_173 = arith.constant 0 : index
    %c0_174 = arith.constant 0 : index
    %c544 = arith.constant 544 : index
    %316 = vector.load %arg13[%c0_173, %c0_174, %c544] : memref<1x4x1024xf32, #tpu.memory_space<vmem>>, vector<1x4x32xf32>
    %317 = vector.shape_cast %316 : vector<1x4x32xf32> to vector<4x32xf32>
    %318 = vector.shape_cast %312 : vector<4x32xf32> to vector<1x4x32xf32>
    tpu.vector_store %arg13[%c0_173, %c0_174, %c544], %318 {strides = array<i32>} : memref<1x4x1024xf32, #tpu.memory_space<vmem>>, vector<1x4x32xf32>,
    %319 = vector.extract_strided_slice %153 {offsets = [0, 160], sizes = [4, 16], strides = [1, 1]} : vector<4x256xf32> to vector<4x16xf32>
    %cst_175 = arith.constant dense<0.000000e+00> : vector<4x32xf32>
    %320 = tpu.matmul %319, %154, %cst_175 {dimension_numbers = #tpu.dot_dimension_numbers<[1], [0], [0], [1], [0, 0, 1, 1], [], []>} : vector<4x16xf32>, vector<16x32xf32>, vector<4x32xf32> -> vector<4x32xf32>
    %cst_176 = arith.constant 2.500000e-01 : f32
    %321 = vector.broadcast %cst_176 : f32 to vector<4x32xf32>
    %322 = arith.mulf %321, %284 : vector<4x32xf32>
    %cst_177 = arith.constant 7.500000e-01 : f32
    %323 = vector.broadcast %cst_177 : f32 to vector<4x32xf32>
    %324 = arith.mulf %323, %302 : vector<4x32xf32>
    %325 = arith.addf %322, %324 : vector<4x32xf32>
    %cst_178 = arith.constant 7.500000e-01 : f32
    %326 = vector.broadcast %cst_178 : f32 to vector<4x32xf32>
    %327 = arith.mulf %326, %302 : vector<4x32xf32>
    %cst_179 = arith.constant 2.500000e-01 : f32
    %328 = vector.broadcast %cst_179 : f32 to vector<4x32xf32>
    %329 = arith.mulf %328, %320 : vector<4x32xf32>
    %330 = arith.addf %327, %329 : vector<4x32xf32>
    %c0_180 = arith.constant 0 : index
    %c0_181 = arith.constant 0 : index
    %c576 = arith.constant 576 : index
    %331 = vector.load %arg13[%c0_180, %c0_181, %c576] : memref<1x4x1024xf32, #tpu.memory_space<vmem>>, vector<1x4x32xf32>
    %332 = vector.shape_cast %331 : vector<1x4x32xf32> to vector<4x32xf32>
    %333 = vector.shape_cast %325 : vector<4x32xf32> to vector<1x4x32xf32>
    tpu.vector_store %arg13[%c0_180, %c0_181, %c576], %333 {strides = array<i32>} : memref<1x4x1024xf32, #tpu.memory_space<vmem>>, vector<1x4x32xf32>,
    %c0_182 = arith.constant 0 : index
    %c0_183 = arith.constant 0 : index
    %c608 = arith.constant 608 : index
    %334 = vector.load %arg13[%c0_182, %c0_183, %c608] : memref<1x4x1024xf32, #tpu.memory_space<vmem>>, vector<1x4x32xf32>
    %335 = vector.shape_cast %334 : vector<1x4x32xf32> to vector<4x32xf32>
    %336 = vector.shape_cast %330 : vector<4x32xf32> to vector<1x4x32xf32>
    tpu.vector_store %arg13[%c0_182, %c0_183, %c608], %336 {strides = array<i32>} : memref<1x4x1024xf32, #tpu.memory_space<vmem>>, vector<1x4x32xf32>,
    %337 = vector.extract_strided_slice %153 {offsets = [0, 176], sizes = [4, 16], strides = [1, 1]} : vector<4x256xf32> to vector<4x16xf32>
    %cst_184 = arith.constant dense<0.000000e+00> : vector<4x32xf32>
    %338 = tpu.matmul %337, %154, %cst_184 {dimension_numbers = #tpu.dot_dimension_numbers<[1], [0], [0], [1], [0, 0, 1, 1], [], []>} : vector<4x16xf32>, vector<16x32xf32>, vector<4x32xf32> -> vector<4x32xf32>
    %cst_185 = arith.constant 2.500000e-01 : f32
    %339 = vector.broadcast %cst_185 : f32 to vector<4x32xf32>
    %340 = arith.mulf %339, %302 : vector<4x32xf32>
    %cst_186 = arith.constant 7.500000e-01 : f32
    %341 = vector.broadcast %cst_186 : f32 to vector<4x32xf32>
    %342 = arith.mulf %341, %320 : vector<4x32xf32>
    %343 = arith.addf %340, %342 : vector<4x32xf32>
    %cst_187 = arith.constant 7.500000e-01 : f32
    %344 = vector.broadcast %cst_187 : f32 to vector<4x32xf32>
    %345 = arith.mulf %344, %320 : vector<4x32xf32>
    %cst_188 = arith.constant 2.500000e-01 : f32
    %346 = vector.broadcast %cst_188 : f32 to vector<4x32xf32>
    %347 = arith.mulf %346, %338 : vector<4x32xf32>
    %348 = arith.addf %345, %347 : vector<4x32xf32>
    %c0_189 = arith.constant 0 : index
    %c0_190 = arith.constant 0 : index
    %c640 = arith.constant 640 : index
    %349 = vector.load %arg13[%c0_189, %c0_190, %c640] : memref<1x4x1024xf32, #tpu.memory_space<vmem>>, vector<1x4x32xf32>
    %350 = vector.shape_cast %349 : vector<1x4x32xf32> to vector<4x32xf32>
    %351 = vector.shape_cast %343 : vector<4x32xf32> to vector<1x4x32xf32>
    tpu.vector_store %arg13[%c0_189, %c0_190, %c640], %351 {strides = array<i32>} : memref<1x4x1024xf32, #tpu.memory_space<vmem>>, vector<1x4x32xf32>,
    %c0_191 = arith.constant 0 : index
    %c0_192 = arith.constant 0 : index
    %c672 = arith.constant 672 : index
    %352 = vector.load %arg13[%c0_191, %c0_192, %c672] : memref<1x4x1024xf32, #tpu.memory_space<vmem>>, vector<1x4x32xf32>
    %353 = vector.shape_cast %352 : vector<1x4x32xf32> to vector<4x32xf32>
    %354 = vector.shape_cast %348 : vector<4x32xf32> to vector<1x4x32xf32>
    tpu.vector_store %arg13[%c0_191, %c0_192, %c672], %354 {strides = array<i32>} : memref<1x4x1024xf32, #tpu.memory_space<vmem>>, vector<1x4x32xf32>,
    %355 = vector.extract_strided_slice %153 {offsets = [0, 192], sizes = [4, 16], strides = [1, 1]} : vector<4x256xf32> to vector<4x16xf32>
    %cst_193 = arith.constant dense<0.000000e+00> : vector<4x32xf32>
    %356 = tpu.matmul %355, %154, %cst_193 {dimension_numbers = #tpu.dot_dimension_numbers<[1], [0], [0], [1], [0, 0, 1, 1], [], []>} : vector<4x16xf32>, vector<16x32xf32>, vector<4x32xf32> -> vector<4x32xf32>
    %cst_194 = arith.constant 2.500000e-01 : f32
    %357 = vector.broadcast %cst_194 : f32 to vector<4x32xf32>
    %358 = arith.mulf %357, %320 : vector<4x32xf32>
    %cst_195 = arith.constant 7.500000e-01 : f32
    %359 = vector.broadcast %cst_195 : f32 to vector<4x32xf32>
    %360 = arith.mulf %359, %338 : vector<4x32xf32>
    %361 = arith.addf %358, %360 : vector<4x32xf32>
    %cst_196 = arith.constant 7.500000e-01 : f32
    %362 = vector.broadcast %cst_196 : f32 to vector<4x32xf32>
    %363 = arith.mulf %362, %338 : vector<4x32xf32>
    %cst_197 = arith.constant 2.500000e-01 : f32
    %364 = vector.broadcast %cst_197 : f32 to vector<4x32xf32>
    %365 = arith.mulf %364, %356 : vector<4x32xf32>
    %366 = arith.addf %363, %365 : vector<4x32xf32>
    %c0_198 = arith.constant 0 : index
    %c0_199 = arith.constant 0 : index
    %c704 = arith.constant 704 : index
    %367 = vector.load %arg13[%c0_198, %c0_199, %c704] : memref<1x4x1024xf32, #tpu.memory_space<vmem>>, vector<1x4x32xf32>
    %368 = vector.shape_cast %367 : vector<1x4x32xf32> to vector<4x32xf32>
    %369 = vector.shape_cast %361 : vector<4x32xf32> to vector<1x4x32xf32>
    tpu.vector_store %arg13[%c0_198, %c0_199, %c704], %369 {strides = array<i32>} : memref<1x4x1024xf32, #tpu.memory_space<vmem>>, vector<1x4x32xf32>,
    %c0_200 = arith.constant 0 : index
    %c0_201 = arith.constant 0 : index
    %c736 = arith.constant 736 : index
    %370 = vector.load %arg13[%c0_200, %c0_201, %c736] : memref<1x4x1024xf32, #tpu.memory_space<vmem>>, vector<1x4x32xf32>
    %371 = vector.shape_cast %370 : vector<1x4x32xf32> to vector<4x32xf32>
    %372 = vector.shape_cast %366 : vector<4x32xf32> to vector<1x4x32xf32>
    tpu.vector_store %arg13[%c0_200, %c0_201, %c736], %372 {strides = array<i32>} : memref<1x4x1024xf32, #tpu.memory_space<vmem>>, vector<1x4x32xf32>,
    %373 = vector.extract_strided_slice %153 {offsets = [0, 208], sizes = [4, 16], strides = [1, 1]} : vector<4x256xf32> to vector<4x16xf32>
    %cst_202 = arith.constant dense<0.000000e+00> : vector<4x32xf32>
    %374 = tpu.matmul %373, %154, %cst_202 {dimension_numbers = #tpu.dot_dimension_numbers<[1], [0], [0], [1], [0, 0, 1, 1], [], []>} : vector<4x16xf32>, vector<16x32xf32>, vector<4x32xf32> -> vector<4x32xf32>
    %cst_203 = arith.constant 2.500000e-01 : f32
    %375 = vector.broadcast %cst_203 : f32 to vector<4x32xf32>
    %376 = arith.mulf %375, %338 : vector<4x32xf32>
    %cst_204 = arith.constant 7.500000e-01 : f32
    %377 = vector.broadcast %cst_204 : f32 to vector<4x32xf32>
    %378 = arith.mulf %377, %356 : vector<4x32xf32>
    %379 = arith.addf %376, %378 : vector<4x32xf32>
    %cst_205 = arith.constant 7.500000e-01 : f32
    %380 = vector.broadcast %cst_205 : f32 to vector<4x32xf32>
    %381 = arith.mulf %380, %356 : vector<4x32xf32>
    %cst_206 = arith.constant 2.500000e-01 : f32
    %382 = vector.broadcast %cst_206 : f32 to vector<4x32xf32>
    %383 = arith.mulf %382, %374 : vector<4x32xf32>
    %384 = arith.addf %381, %383 : vector<4x32xf32>
    %c0_207 = arith.constant 0 : index
    %c0_208 = arith.constant 0 : index
    %c768 = arith.constant 768 : index
    %385 = vector.load %arg13[%c0_207, %c0_208, %c768] : memref<1x4x1024xf32, #tpu.memory_space<vmem>>, vector<1x4x32xf32>
    %386 = vector.shape_cast %385 : vector<1x4x32xf32> to vector<4x32xf32>
    %387 = vector.shape_cast %379 : vector<4x32xf32> to vector<1x4x32xf32>
    tpu.vector_store %arg13[%c0_207, %c0_208, %c768], %387 {strides = array<i32>} : memref<1x4x1024xf32, #tpu.memory_space<vmem>>, vector<1x4x32xf32>,
    %c0_209 = arith.constant 0 : index
    %c0_210 = arith.constant 0 : index
    %c800 = arith.constant 800 : index
    %388 = vector.load %arg13[%c0_209, %c0_210, %c800] : memref<1x4x1024xf32, #tpu.memory_space<vmem>>, vector<1x4x32xf32>
    %389 = vector.shape_cast %388 : vector<1x4x32xf32> to vector<4x32xf32>
    %390 = vector.shape_cast %384 : vector<4x32xf32> to vector<1x4x32xf32>
    tpu.vector_store %arg13[%c0_209, %c0_210, %c800], %390 {strides = array<i32>} : memref<1x4x1024xf32, #tpu.memory_space<vmem>>, vector<1x4x32xf32>,
    %391 = vector.extract_strided_slice %153 {offsets = [0, 224], sizes = [4, 16], strides = [1, 1]} : vector<4x256xf32> to vector<4x16xf32>
    %cst_211 = arith.constant dense<0.000000e+00> : vector<4x32xf32>
    %392 = tpu.matmul %391, %154, %cst_211 {dimension_numbers = #tpu.dot_dimension_numbers<[1], [0], [0], [1], [0, 0, 1, 1], [], []>} : vector<4x16xf32>, vector<16x32xf32>, vector<4x32xf32> -> vector<4x32xf32>
    %cst_212 = arith.constant 2.500000e-01 : f32
    %393 = vector.broadcast %cst_212 : f32 to vector<4x32xf32>
    %394 = arith.mulf %393, %356 : vector<4x32xf32>
    %cst_213 = arith.constant 7.500000e-01 : f32
    %395 = vector.broadcast %cst_213 : f32 to vector<4x32xf32>
    %396 = arith.mulf %395, %374 : vector<4x32xf32>
    %397 = arith.addf %394, %396 : vector<4x32xf32>
    %cst_214 = arith.constant 7.500000e-01 : f32
    %398 = vector.broadcast %cst_214 : f32 to vector<4x32xf32>
    %399 = arith.mulf %398, %374 : vector<4x32xf32>
    %cst_215 = arith.constant 2.500000e-01 : f32
    %400 = vector.broadcast %cst_215 : f32 to vector<4x32xf32>
    %401 = arith.mulf %400, %392 : vector<4x32xf32>
    %402 = arith.addf %399, %401 : vector<4x32xf32>
    %c0_216 = arith.constant 0 : index
    %c0_217 = arith.constant 0 : index
    %c832 = arith.constant 832 : index
    %403 = vector.load %arg13[%c0_216, %c0_217, %c832] : memref<1x4x1024xf32, #tpu.memory_space<vmem>>, vector<1x4x32xf32>
    %404 = vector.shape_cast %403 : vector<1x4x32xf32> to vector<4x32xf32>
    %405 = vector.shape_cast %397 : vector<4x32xf32> to vector<1x4x32xf32>
    tpu.vector_store %arg13[%c0_216, %c0_217, %c832], %405 {strides = array<i32>} : memref<1x4x1024xf32, #tpu.memory_space<vmem>>, vector<1x4x32xf32>,
    %c0_218 = arith.constant 0 : index
    %c0_219 = arith.constant 0 : index
    %c864 = arith.constant 864 : index
    %406 = vector.load %arg13[%c0_218, %c0_219, %c864] : memref<1x4x1024xf32, #tpu.memory_space<vmem>>, vector<1x4x32xf32>
    %407 = vector.shape_cast %406 : vector<1x4x32xf32> to vector<4x32xf32>
    %408 = vector.shape_cast %402 : vector<4x32xf32> to vector<1x4x32xf32>
    tpu.vector_store %arg13[%c0_218, %c0_219, %c864], %408 {strides = array<i32>} : memref<1x4x1024xf32, #tpu.memory_space<vmem>>, vector<1x4x32xf32>,
    %409 = vector.extract_strided_slice %153 {offsets = [0, 240], sizes = [4, 16], strides = [1, 1]} : vector<4x256xf32> to vector<4x16xf32>
    %cst_220 = arith.constant dense<0.000000e+00> : vector<4x32xf32>
    %410 = tpu.matmul %409, %154, %cst_220 {dimension_numbers = #tpu.dot_dimension_numbers<[1], [0], [0], [1], [0, 0, 1, 1], [], []>} : vector<4x16xf32>, vector<16x32xf32>, vector<4x32xf32> -> vector<4x32xf32>
    %cst_221 = arith.constant 2.500000e-01 : f32
    %411 = vector.broadcast %cst_221 : f32 to vector<4x32xf32>
    %412 = arith.mulf %411, %374 : vector<4x32xf32>
    %cst_222 = arith.constant 7.500000e-01 : f32
    %413 = vector.broadcast %cst_222 : f32 to vector<4x32xf32>
    %414 = arith.mulf %413, %392 : vector<4x32xf32>
    %415 = arith.addf %412, %414 : vector<4x32xf32>
    %cst_223 = arith.constant 7.500000e-01 : f32
    %416 = vector.broadcast %cst_223 : f32 to vector<4x32xf32>
    %417 = arith.mulf %416, %392 : vector<4x32xf32>
    %cst_224 = arith.constant 2.500000e-01 : f32
    %418 = vector.broadcast %cst_224 : f32 to vector<4x32xf32>
    %419 = arith.mulf %418, %410 : vector<4x32xf32>
    %420 = arith.addf %417, %419 : vector<4x32xf32>
    %c0_225 = arith.constant 0 : index
    %c0_226 = arith.constant 0 : index
    %c896 = arith.constant 896 : index
    %421 = vector.load %arg13[%c0_225, %c0_226, %c896] : memref<1x4x1024xf32, #tpu.memory_space<vmem>>, vector<1x4x32xf32>
    %422 = vector.shape_cast %421 : vector<1x4x32xf32> to vector<4x32xf32>
    %423 = vector.shape_cast %415 : vector<4x32xf32> to vector<1x4x32xf32>
    tpu.vector_store %arg13[%c0_225, %c0_226, %c896], %423 {strides = array<i32>} : memref<1x4x1024xf32, #tpu.memory_space<vmem>>, vector<1x4x32xf32>,
    %c0_227 = arith.constant 0 : index
    %c0_228 = arith.constant 0 : index
    %c928 = arith.constant 928 : index
    %424 = vector.load %arg13[%c0_227, %c0_228, %c928] : memref<1x4x1024xf32, #tpu.memory_space<vmem>>, vector<1x4x32xf32>
    %425 = vector.shape_cast %424 : vector<1x4x32xf32> to vector<4x32xf32>
    %426 = vector.shape_cast %420 : vector<4x32xf32> to vector<1x4x32xf32>
    tpu.vector_store %arg13[%c0_227, %c0_228, %c928], %426 {strides = array<i32>} : memref<1x4x1024xf32, #tpu.memory_space<vmem>>, vector<1x4x32xf32>,
    %cst_229 = arith.constant 2.500000e-01 : f32
    %427 = vector.broadcast %cst_229 : f32 to vector<4x32xf32>
    %428 = arith.mulf %427, %392 : vector<4x32xf32>
    %cst_230 = arith.constant 7.500000e-01 : f32
    %429 = vector.broadcast %cst_230 : f32 to vector<4x32xf32>
    %430 = arith.mulf %429, %410 : vector<4x32xf32>
    %431 = arith.addf %428, %430 : vector<4x32xf32>
    %cst_231 = arith.constant 7.500000e-01 : f32
    %432 = vector.broadcast %cst_231 : f32 to vector<4x32xf32>
    %433 = arith.mulf %432, %410 : vector<4x32xf32>
    %cst_232 = arith.constant 2.500000e-01 : f32
    %434 = vector.broadcast %cst_232 : f32 to vector<4x32xf32>
    %435 = arith.mulf %434, %410 : vector<4x32xf32>
    %436 = arith.addf %433, %435 : vector<4x32xf32>
    %c0_233 = arith.constant 0 : index
    %c0_234 = arith.constant 0 : index
    %c960 = arith.constant 960 : index
    %437 = vector.load %arg13[%c0_233, %c0_234, %c960] : memref<1x4x1024xf32, #tpu.memory_space<vmem>>, vector<1x4x32xf32>
    %438 = vector.shape_cast %437 : vector<1x4x32xf32> to vector<4x32xf32>
    %439 = vector.shape_cast %431 : vector<4x32xf32> to vector<1x4x32xf32>
    tpu.vector_store %arg13[%c0_233, %c0_234, %c960], %439 {strides = array<i32>} : memref<1x4x1024xf32, #tpu.memory_space<vmem>>, vector<1x4x32xf32>,
    %c0_235 = arith.constant 0 : index
    %c0_236 = arith.constant 0 : index
    %c992 = arith.constant 992 : index
    %440 = vector.load %arg13[%c0_235, %c0_236, %c992] : memref<1x4x1024xf32, #tpu.memory_space<vmem>>, vector<1x4x32xf32>
    %441 = vector.shape_cast %440 : vector<1x4x32xf32> to vector<4x32xf32>
    %442 = vector.shape_cast %436 : vector<4x32xf32> to vector<1x4x32xf32>
    tpu.vector_store %arg13[%c0_235, %c0_236, %c992], %442 {strides = array<i32>} : memref<1x4x1024xf32, #tpu.memory_space<vmem>>, vector<1x4x32xf32>,
    return
  }
  func.func @transform_0(%arg0: i32) -> (i32, i32, i32) {
    %c0_i32 = arith.constant 0 : i32
    %c0_i32_0 = arith.constant 0 : i32
    %c0_i32_1 = arith.constant 0 : i32
    return %arg0, %c0_i32, %c0_i32_0 : i32, i32, i32
  }
  func.func @transform_1(%arg0: i32) -> (i32, i32) {
    %c0_i32 = arith.constant 0 : i32
    %c0_i32_0 = arith.constant 0 : i32
    %c0_i32_1 = arith.constant 0 : i32
    return %c0_i32, %c0_i32_0 : i32, i32
  }
  func.func @transform_2(%arg0: i32) -> (i32, i32) {
    %c0_i32 = arith.constant 0 : i32
    %c0_i32_0 = arith.constant 0 : i32
    %c0_i32_1 = arith.constant 0 : i32
    return %c0_i32, %c0_i32_0 : i32, i32
  }
  func.func @transform_3(%arg0: i32) -> (i32, i32) {
    %c0_i32 = arith.constant 0 : i32
    %c0_i32_0 = arith.constant 0 : i32
    %c0_i32_1 = arith.constant 0 : i32
    return %c0_i32, %c0_i32_0 : i32, i32
  }
  func.func @transform_4(%arg0: i32) -> (i32, i32) {
    %c0_i32 = arith.constant 0 : i32
    %c0_i32_0 = arith.constant 0 : i32
    %c0_i32_1 = arith.constant 0 : i32
    return %c0_i32, %c0_i32_0 : i32, i32
  }
  func.func @transform_5(%arg0: i32) -> (i32, i32) {
    %c0_i32 = arith.constant 0 : i32
    %c0_i32_0 = arith.constant 0 : i32
    %c0_i32_1 = arith.constant 0 : i32
    return %c0_i32, %c0_i32_0 : i32, i32
  }
  func.func @transform_6(%arg0: i32) -> (i32, i32) {
    %c0_i32 = arith.constant 0 : i32
    %c0_i32_0 = arith.constant 0 : i32
    %c0_i32_1 = arith.constant 0 : i32
    return %c0_i32, %c0_i32_0 : i32, i32
  }
  func.func @transform_7(%arg0: i32) -> (i32, i32) {
    %c0_i32 = arith.constant 0 : i32
    %c0_i32_0 = arith.constant 0 : i32
    %c0_i32_1 = arith.constant 0 : i32
    return %c0_i32, %c0_i32_0 : i32, i32
  }
  func.func @transform_8(%arg0: i32) -> (i32, i32) {
    %c0_i32 = arith.constant 0 : i32
    %c0_i32_0 = arith.constant 0 : i32
    %c0_i32_1 = arith.constant 0 : i32
    return %c0_i32, %c0_i32_0 : i32, i32
  }
  func.func @transform_9(%arg0: i32) -> (i32, i32) {
    %c0_i32 = arith.constant 0 : i32
    %c0_i32_0 = arith.constant 0 : i32
    %c0_i32_1 = arith.constant 0 : i32
    return %c0_i32, %c0_i32_0 : i32, i32
  }
  func.func @transform_10(%arg0: i32) -> (i32, i32) {
    %c0_i32 = arith.constant 0 : i32
    %c0_i32_0 = arith.constant 0 : i32
    %c0_i32_1 = arith.constant 0 : i32
    return %c0_i32, %c0_i32_0 : i32, i32
  }
  func.func @transform_11(%arg0: i32) -> (i32, i32) {
    %c0_i32 = arith.constant 0 : i32
    %c0_i32_0 = arith.constant 0 : i32
    %c0_i32_1 = arith.constant 0 : i32
    return %c0_i32, %c0_i32_0 : i32, i32
  }
  func.func @transform_12(%arg0: i32) -> (i32, i32, i32) {
    %c0_i32 = arith.constant 0 : i32
    %c0_i32_0 = arith.constant 0 : i32
    %c0_i32_1 = arith.constant 0 : i32
    return %arg0, %c0_i32, %c0_i32_0 : i32, i32, i32
  }
}

</mosaic_0001>

<bundles_post_ra>
// kernel: tpu_custom_call.1
= control target key start
LH: loop header
LB: loop body
LE: loop exit
PB: predicated region body
PF: predicated region fallthrough
CT: control target
= control target key end

     0   :  { %17 = vsyncpa [#allocation4], 0  ;;  %s4711_s0 = inlined_call_operand.hbm [shape: f32[2,16,256], index: 0, kind: input, shape index: {}]   ;;  %s4712_s1 = inlined_call_operand.vmem [shape: f32[2,256], index: 1, kind: input, shape index: {}]   ;;  %s4713_s2 = inlined_call_operand.vmem [shape: bf16[8,16], index: 2, kind: input, shape index: {}]   ;;  %s4714_s3 = inlined_call_operand.vmem [shape: f32[8,1], index: 3, kind: input, shape index: {}]   ;;  %s4715_s4 = inlined_call_operand.vmem [shape: bf16[8,72], index: 4, kind: input, shape index: {}]   ;;  %s4716_s5 = inlined_call_operand.vmem [shape: f32[8,1], index: 5, kind: input, shape index: {}]   ;;  %s4717_s6 = inlined_call_operand.vmem [shape: f32[2,256], index: 6, kind: input, shape index: {}]   ;;  %s4718_s7 = inlined_call_operand.vmem [shape: bf16[4,8], index: 7, kind: input, shape index: {}]   ;;  %s4719_s8 = inlined_call_operand.vmem [shape: f32[4,1], index: 8, kind: input, shape index: {}]   ;;  %s4720_s9 = inlined_call_operand.vmem [shape: bf16[4,36], index: 9, kind: input, shape index: {}]   ;;  %s4721_s10 = inlined_call_operand.vmem [shape: f32[4,1], index: 10, kind: input, shape index: {}]   ;;  %s4722_s11 = inlined_call_operand.vmem [shape: f32[16,32], index: 11, kind: input, shape index: {}]   ;;  %s4723_s12 = inlined_call_operand.hbm [shape: f32[2,4,1024], index: 12, kind: output, shape index: {}]  }
   0x1   :  { %19 = vsyncpa [#allocation4 + $0x1], 0 }
   0x2   :  { %20 = vsyncpa [#allocation5], 0 }
   0x3   :  { %22 = vsyncpa [#allocation5 + $0x1], 0  ;;  %s4030_s21 = smov 0   ;;  %s4032_s22 = smov 0  }
   0x4   :  { %s4034_s23 = smov 0   ;;  %s4036_s24 = smov 0  }
   0x5 LB: > { %4749 = sst [smem:[#allocation9_spill]] %s3929_s23  ;;  %s4051_s25 = sadd.s32 4294967295, %s3933_s24   ;;  %s3933_s24 = sphi %s4036_s24, %s4772_s24   ;;  %s3929_s23 = sphi %s4034_s23, %s4774_s23   ;;  %s3925_s22 = sphi %s4032_s22, %s4776_s22   ;;  %s3921_s21 = sphi %s4030_s21, %s4775_s21  }
   0x6   : > { %s3478_s26 = sadd.s32 4294967294, %s3933_s24   ;;  %s4055_s27 = sadd.s32 1, %s3933_s24  }
   0x7   : > { %4750 = sst [smem:[#allocation10_spill]] %s4055_s27  ;;  %s35_s28 = sadd.s32 1, %s3929_s23 }
   0x8   : > { %s32_s29 = ssub.s32 %s3933_s24, %s4055_s27  ;;  %p42_p0 = scmp.ne.s32.totalorder %s3929_s23, %s3925_s22 }
   0x9   : > { %p33_p1 = scmp.eq.s32.totalorder %s32_s29, 0  ;;  %p43_p2 = scmp.eq.s32.totalorder %s3933_s24, 0 }
   0xa   : > { %p48_p3 = scmp.ne.s32.totalorder %s3925_s22, %s3921_s21  ;;  %p49_p4 = scmp.eq.s32.totalorder %s4051_s25, 0 }
   0xb   : > { %s4067_s30 = scalar_select %p33_p1, %s3929_s23, %s35_s28  }
   0xc   : > { %p4069_p5 = por %p43_p2, %p42_p0  ;;  %p4073_p6 = por %p49_p4, %p48_p3 }
   0xd   : > { %4751 = sst [smem:[#allocation11_spill]] %s4067_s30  ;;  %p303_p7 = scmp.eq.s32.totalorder %s4051_s25, 1 }
   0xe   : > { %p309_p8 = scmp.eq.s32.totalorder %s3478_s26, 1  ;;  %p3772_p10 = scmp.lt.s32.totalorder %s3933_s24, 2 }
   0xf   : > { %p4080_p11 = por %p303_p7, %p42_p0  ;;  %s362_s17 = sand.u32 1, %s3929_s23  }
  0x10   : > { %p4084_p12 = por %p309_p8, %p48_p3  ;;  %s3550_s18 = sshll.u32 %s3933_s24, 9 }
  0x11   : > { %s4754_s15 = scalar_select %p4080_p11, 1, 0 }
  0x12   : > { %s4755_s16 = scalar_select %p4084_p12, 1, 0 }
  0x13   : > { %s3481_s19 = sshll.u32 %s362_s17, 5  ;;  %s4093_s29 = scalar_lea.hbm %s4711_s0, %s3550_s18 }
  0x14   : > { %s366_s26 = scalar_lea.vmem [#allocation3], %s3481_s19  ;;  %p4097_p13 = pnand %p3772_p10, %p4069_p5 }
  0x15   : > { %s373_s30 = sshll.u32 %s366_s26, 4  ;;  %s4103_s23 = scalar_lea.sflag [#allocation4], %s362_s17  ;;  %s4101_s30 = int_to_ptr.vmem [resolvable:$true] %s373_s30 }
  0x16   : > { %s3837_s20 = scalar_lea.hbm %s4093_s29, 512  ;;  %p3839_p1 = pneg %p4097_p13 }
  0x17   : > { %p3838_p0 = scmp.ne.s32.totalorder %s4093_s29, %s3837_s20  ;;  %s3842_s19 = scalar_lea.hbm %s4711_s0, 1024 }
  0x18   : > { %p3843_p4 = scmp.lt.u32.totalorder %s4093_s29, %s4711_s0  ;;  %p3844_p5 = scmp.lt.u32.totalorder %s3842_s19, %s3837_s20 }
  0x19   : > { %p3840_p2 = pnand %p3839_p1, %p3838_p0  ;;  %p3846_p8 = scmp.lt.u32.totalorder %s3837_s20, %s4093_s29 }
  0x1a   : > { %p3845_p7 = por %p3844_p5, %p3843_p4 }
  0x1b   : > { %p3841_p3 = pneg %p3840_p2 }
  0x1c   : > { %p3847_p10 = por %p3846_p8, %p3845_p7 }
  0x1e   : > { %p3848_p9 = pnand %p3847_p10, %p3841_p3 }
  0x20   : > { %3851 = shalt.err (!%p3848_p9)
}
  0x21   : > { %s3852_s17 = scalar_lea.vmem %s4101_s30, 512  ;;  %s3935_s18 = smov [#allocation3]  }
  0x22   : > { %p3853_p0 = scmp.ne.s32.totalorder %s4101_s30, %s3852_s17  ;;  %s3857_s13 = sshll.u32 %s3935_s18, 4  ;;  %s3858_s13 = int_to_ptr.vmem [resolvable:$false] %s3857_s13 }
  0x23   : > { %s3859_s28 = scalar_lea.vmem %s3858_s13, 1024  ;;  %p3860_p11 = scmp.lt.s32.totalorder %s4101_s30, %s3858_s13 }
  0x24   : > { %p3855_p2 = pnand %p3853_p0, %p3839_p1  ;;  %p3861_p4 = scmp.lt.s32.totalorder %s3859_s28, %s3852_s17 }
  0x26   : > { %p3856_p12 = pneg %p3855_p2  ;;  %p3862_p5 = por %p3861_p4, %p3860_p11 }
  0x28   : > { %p3863_p7 = pnand %p3862_p5, %p3856_p12 }
  0x2a   : > { %3866 = shalt.err (!%p3863_p7)
}
  0x2b   : > { %s3936_s20 = smov 256   ;;  %s3937_s19 = smov 16  }
  0x2c   : > { %3767 = dma.hbm_to_vmem [thread:$0]  (!%p4097_p13), %s4093_s29, 512, %s4101_s30, %s4103_s23, %s3936_s20, %s3936_s20, %s3937_s19  }
  0x2d   : > { %p3484_p9 = scmp.ge.s32.totalorder %s3933_s24, 1  ;;  %p381_p1 = scmp.lt.s32.totalorder %s3933_s24, 3 }
  0x2f   : > { %p382_p3 = pnand %p3484_p9, %p381_p1 }
  0x30   : > { %s4134_s26 = sand.u32 (!%p382_p3), 1, %s3925_s22  }
  0x31   : > { %385 = sbr.rel (%p382_p3) target bundleno = 1791 (0x6ff), region = 68  ;;  %s4728_s17 = sshll.u32 (!%p382_p3), %s4134_s26, 5 }
  0x32   : > { %s388_s18 = scalar_lea.sflag (!%p382_p3), [#allocation4], %s4134_s26  ;;  %s391_s13 = scalar_lea.vmem (!%p382_p3), [#allocation3], %s4728_s17 }
  0x38   : > { %3912 = dma.done.wait (%p4073_p6), %s388_s18, 512  }
  0x39   : > { %3914 = vsyncadd (%p4073_p6), %s388_s18, 4294966784  ;;  %v504_v0 = vlaneseq  ;;  %v3938_v1 = vmov 0   ;;  %v434_v5 = vld [vmem:[%s391_s13 + $0x8] sm:$0xff]  ;;  %v436_v6 = vld [vmem:[%s391_s13 + $0x18] sm:$0xff]  ;;  %vm495_vm0 = vcmask 1048440   ;;  %v3939_v13 = vmov 0.0  }
  0x3a   : > { %482 = vmatprep.mubr.bf16.mxu0 %v3938_v1  ;;  %3834 = vset.pattern.permute.xlu0 %v3938_v1  ;;  %v433_v7 = vld [vmem:[%s391_s13] sm:$0xff]  ;;  %v439_v8 = vpack.c.bf16 %v436_v6, %v434_v5  ;;  %v435_v9 = vld [vmem:[%s391_s13 + $0x10] sm:$0xff]  ;;  %496 = vst.msk [vmem:[#allocation2] sm:$0xff] %vm495_vm0, %v3939_v13  ;;  %vm446_vm1 = vcmask 130048   ;;  %s4729_s18 = smov 111   ;;  %vm1280_vm2 = vcmask 1044344  }
  0x3b   : > { %v4146_v2 = vshrl.u32 %v504_v0, 7  ;;  %604 = vmatprep.mubr.bf16.mxu1 %v3938_v1  ;;  %3835 = vset.pattern.permute.xlu1 %v3938_v1  ;;  %v440_v10 = vld [vmem:[%s4714_s3] sm:$0xff]  ;;  %v438_v11 = vpack.c.bf16 %v435_v9, %v433_v7  ;;  %s4747_s13 = smov 113   ;;  %s4745_s23 = smov 127   ;;  %vm497_vm3 = vcmask 138240   ;;  %vm1282_vm4 = vcmask 134144  }
  0x3c   : > { %443 = vperm.xlu0 %3834, %v440_v10   ;;  %v502_v12 = vld [vmem:[%s4712_s1] ss:$2 sm:$0x3]  ;;  %450 = vmatprep.subr.bf16.mxu0 %v439_v8  ;;  %v3488_v16 = vld [vmem:[%s4712_s1 + $0x1] ss:$2 sm:$0x3] }
  0x3d   : > { %v4151_v3 = vsub.s32 1, %v4146_v2  ;;  %v4154_v4 = vsub.s32 0, %v4146_v2  ;;  %451 = vmatpush1.bf16.msra.mxu0 %v438_v11  ;;  %v437_v17 = vld [vmem:[%s4713_s2] sm:$0xf]  ;;  %s3943_s27 = smov 1   ;;  %s4741_s30 = smov 15  }
  0x3e   : > { %s4739_s14 = smov 17   ;;  %v4191_v21 = vld [vmem:[%s4715_s4] sm:$0xf]  ;;  %s4736_s20 = smov 120   ;;  %498 = vst.msk [vmem:[#allocation2 + $0x18] sm:$0xff] %vm497_vm3, %v3939_v13  ;;  %vm530_vm5 = vcmask 908288  }
  0x3f   : > { %v511_v14 = vrot.slane %v502_v12, %v4151_v3  ;;  %v507_v15 = vrot.slane %v502_v12, %v4154_v4  ;;  %v518_v18 = vrot.slane %v3488_v16, %v4154_v4  ;;  %v522_v19 = vrot.slane %v3488_v16, %v4151_v3  ;;  %s4737_s19 = smov 16   ;;  %s4731_s17 = smov 96  }
  0x40   : > { %3487 = vmatmul.mubr.msk.bf16.vlgmr.msra.gmra.mrb[0].mxu0 %vm446_vm1, %v437_v17  ;;  %v4195_v22 = vcombine.low %v4191_v21, %v4191_v21  ;;  %s4735_s29 = smov 104   ;;  %vm679_vm6 = vcmask 924672   ;;  %vm760_vm7 = vcmask 1039360   ;;  %vm782_vm8 = vcmask 7168   ;;  %s4733_s28 = smov 80  }
  0x41   : > { %528 = vrot.lane.b32.xlu1 %v511_v14, %s4729_s18  ;;  %526 = vrot.lane.b32.xlu0 %v507_v15, %s4729_s18  ;;  %v523_v20 = vld [vmem:[#allocation2] sm:$0xff]  ;;  %s3949_s18 = smov 112   ;;  %vm701_vm9 = vcmask 121856   ;;  %vm565_vm10 = vcmask 1043456   ;;  %vm561_vm11 = vcmask 64512   ;;  %vm1070_vm12 = vcmask 916480  }
  0x42   : > { %666 = vmatprep.mubr.bf16.mxu0 %v3938_v1  ;;  %1281 = vst.msk [vmem:[#allocation2] sm:$0xf] %vm1280_vm2, %v3939_v13  ;;  %v541_v23 = vpack.c.bf16 %v523_v20, %v523_v20  ;;  %vm1353_vm13 = vcmask 1041408   ;;  %vm1349_vm14 = vcmask 31744   ;;  %vm3961_vm15 = vmmov 0   ;;  %p4769_p11 = scmp.ne.s32.totalorder %s4754_s15, 0 }
  0x43   : > { %vm2167_vm0 = vcmask 257024   ;;  %vm2257_vm2 = vcmask 781824  }
  0x45   : > { %675 = vrot.lane.b32.xlu1 %v518_v18, %s4747_s13  ;;  %677 = vrot.lane.b32.xlu0 %v522_v19, %s4747_s13  ;;  %v4208_v24 = vld [vmem:[#allocation2 + $0x18] sm:$0xff] }
  0x46   : > { %1283 = vst.msk [vmem:[#allocation2 + $0x18] sm:$0xf] %vm1282_vm4, %v3939_v13 }
  0x49   : > { %756 = vrot.lane.b32.xlu1 %v507_v15, %s4745_s23  ;;  %758 = vrot.lane.b32.xlu0 %v511_v14, %s4745_s23 }
  0x4d   : > { %894 = vrot.lane.b32.xlu1 %v518_v18, %s3943_s27  ;;  %896 = vrot.lane.b32.xlu0 %v522_v19, %s3943_s27 }
  0x51   : > { %975 = vrot.lane.b32.xlu1 %v507_v15, %s4741_s30  ;;  %977 = vrot.lane.b32.xlu0 %v511_v14, %s4741_s30 }
  0x55   : > { %1125 = vrot.lane.b32.xlu1 %v518_v18, %s4739_s14  ;;  %1127 = vrot.lane.b32.xlu0 %v522_v19, %s4739_s14 }
  0x59   : > { %547 = vrot.lane.b32.xlu0 %v4195_v22, %s4736_s20  ;;  %552 = vrot.lane.b32.xlu1 %v541_v23, %s4737_s19  ;;  %s3956_s20 = smov 124  }
  0x5d   : > { %837 = vrot.lane.b32.xlu0 %v4195_v22, %s4731_s17  ;;  %690 = vrot.lane.b32.xlu1 %v4195_v22, %s3949_s18  ;;  %s3952_s17 = smov 88  }
  0x61   : > { %771 = vrot.lane.b32.xlu1 %v4195_v22, %s4735_s29  ;;  %s3954_s29 = smov 72  }
  0xb3   : > { %v529_v25 = vpop.permute.xlu1 %528 }
  0xb7   : > { %v676_v26 = vpop.permute.xlu1 %675 }
  0xb8   : > { %v684_v27 = vmul.f32 %v676_v26, %v523_v20 }
  0xba   : > { %v687_v28 = vpack.c.bf16 %v684_v27, %v684_v27 }
  0xbb   : > { %v757_v29 = vpop.permute.xlu1 %756  ;;  %v444_v31 = vpop.permute.xlu0 %443 }
  0xbc   : > { %v765_v30 = vmul.f32 %v757_v29, %v523_v20  ;;  %695 = vrot.lane.b32.xlu0 %v687_v28, %s4741_s30 }
  0xbe   : > { %v768_v32 = vpack.c.bf16 %v765_v30, %v765_v30 }
  0xbf   : > { %v527_v33 = vpop.permute.xlu0 %526  ;;  %v895_v46 = vpop.permute.xlu1 %894 }
  0xc0   : > { %776 = vrot.lane.b32.xlu0 %v768_v32, %s3943_s27  ;;  %v535_v34 = vmul.f32 %v527_v33, %v523_v20  ;;  %v531_v50 = vsel %vm530_vm5, %v527_v33, %v529_v25  ;;  %v1058_v32 = vpack.c.bf16 %v4208_v24, %v4208_v24 }
  0xc2   : > { %v538_v35 = vpack.c.bf16 %v535_v34, %v535_v34 }
  0xc3   : > { %v678_v36 = vpop.permute.xlu0 %677  ;;  %v976_v56 = vpop.permute.xlu1 %975 }
  0xc4   : > { %616 = vrot.lane.b32.xlu1 %v538_v35, %s4739_s14  ;;  %v680_v51 = vsel %vm679_vm6, %v676_v26, %v678_v36 }
  0xc7   : > { %v759_v38 = vpop.permute.xlu0 %758 }
  0xc8   : > { %v761_v57 = vsel %vm760_vm7, %v757_v29, %v759_v38 }
  0xcb   : > { %v897_v49 = vpop.permute.xlu0 %896 }
  0xcc   : > { %v905_v14 = vmul.f32 %v897_v49, %v4208_v24  ;;  %v899_v17 = vsel %vm782_vm8, %v895_v46, %v897_v49 }
  0xce   : > { %v908_v18 = vpack.c.bf16 %v905_v14, %v905_v14 }
  0xcf   : > { %v978_v60 = vpop.permute.xlu0 %977 }
  0xd0   : > { %v986_v63 = vmul.f32 %v978_v60, %v4208_v24  ;;  %v980_v20 = vsel %vm701_vm9, %v976_v56, %v978_v60 }
  0xd2   : > { %v989_v7 = vpack.c.bf16 %v986_v63, %v986_v63 }
  0xd3   : > { %v1128_v27 = vpop.permute.xlu0 %1127 }
 0x113   : > { %v484_v37 = vpop.f32.mrb[0].mxu0 }
 0x114   : > { %v485_v39 = vadd.f32 %v484_v37, %v444_v31  ;;  %v486_v40 = vpop.f32.mrb[1].mxu0  ;;  %v1205_v37 = vld [vmem:[%s4716_s5] sm:$0xff] }
 0x115   : > { %v487_v41 = vadd.f32 %v486_v40, %v444_v31  ;;  %v488_v42 = vpop.f32.mrb[2].mxu0  ;;  %v1135_v31 = vmul.f32 %v1128_v27, %v4208_v24  ;;  %v1220_v24 = vld [vmem:[%s4719_s8] sm:$0xf] }
 0x116   : > { %v491_v43 = vmul.f32 0.01, %v485_v39  ;;  %v489_v44 = vpop.f32.mrb[3].mxu0 }
 0x117   : > { %v492_v45 = vmul.f32 0.01, %v487_v41  ;;  %v1138_v35 = vpack.c.bf16 %v1135_v31, %v1135_v31 }
 0x118   : > { %v493_v47 = vmax.f32 %v485_v39, %v491_v43 }
 0x119   : > { %v4214_v48 = vmax.f32 %v487_v41, %v492_v45 }
 0x11a   : > { %499 = vst [vmem:[#allocation2 + $0x8] sm:$0xff] %v493_v47  ;;  %v4218_v52 = vpack.c.bf16 %v493_v47, %v493_v47  ;;  %v536_v54 = vmul.f32 %v531_v50, %v493_v47  ;;  %v685_v55 = vmul.f32 %v680_v51, %v493_v47  ;;  %v984_v58 = vmul.f32 %v976_v56, %v493_v47 }
 0x11b   : > { %500 = vst [vmem:[#allocation2 + $0x10] sm:$0xff] %v4214_v48  ;;  %v4223_v53 = vpack.c.bf16 %v4214_v48, %v4214_v48  ;;  %v766_v62 = vmul.f32 %v761_v57, %v493_v47  ;;  %v537_v6 = vmul.f32 %v529_v25, %v4214_v48  ;;  %v686_v8 = vmul.f32 %v678_v36, %v4214_v48  ;;  %v1126_v25 = vpop.permute.xlu1 %1125 }
 0x11c   : > { %554 = vrot.lane.b32.xlu0 %v4218_v52, %s4737_s19  ;;  %v539_v59 = vpack.c.bf16 %v536_v54, %v536_v54  ;;  %v688_v61 = vpack.c.bf16 %v685_v55, %v685_v55  ;;  %v987_v0 = vpack.c.bf16 %v984_v58, %v984_v58  ;;  %v903_v9 = vmul.f32 %v895_v46, %v493_v47 }
 0x11d   : > { %556 = vrot.lane.b32.xlu1 %v4223_v53, %s4737_s19  ;;  %v769_v5 = vpack.c.bf16 %v766_v62, %v766_v62  ;;  %v540_v10 = vpack.c.bf16 %v537_v6, %v537_v6  ;;  %v767_v11 = vmul.f32 %v759_v38, %v4214_v48  ;;  %v689_v12 = vpack.c.bf16 %v686_v8, %v686_v8  ;;  %v548_v38 = vpop.permute.xlu0 %547  ;;  %s4765_s19 = smov 96  }
 0x11e   : > { %v906_v15 = vpack.c.bf16 %v903_v9, %v903_v9  ;;  %v904_v19 = vmul.f32 %v899_v17, %v4214_v48  ;;  %v985_v26 = vmul.f32 %v980_v20, %v4214_v48  ;;  %v1133_v28 = vmul.f32 %v1126_v25, %v493_v47 }
 0x11f   : > { %v770_v16 = vpack.c.bf16 %v767_v11, %v767_v11  ;;  %v1129_v30 = vsel %vm497_vm3, %v1126_v25, %v1128_v27  ;;  %v553_v39 = vpop.permute.xlu1 %552  ;;  %v843_v11 = vsel %vm565_vm10, %v4218_v52, 0 }
 0x120   : > { %618 = vrot.lane.b32.xlu0 %v539_v59, %s4739_s14  ;;  %v907_v23 = vpack.c.bf16 %v904_v19, %v904_v19  ;;  %v988_v29 = vpack.c.bf16 %v985_v26, %v985_v26  ;;  %v1136_v33 = vpack.c.bf16 %v1133_v28, %v1133_v28  ;;  %v1134_v34 = vmul.f32 %v1129_v30, %v4214_v48 }
 0x121   : > { %697 = vrot.lane.b32.xlu1 %v688_v61, %s4741_s30  ;;  %v838_v40 = vpop.permute.xlu0 %837 }
 0x122   : > { %v1137_v36 = vpack.c.bf16 %v1134_v34, %v1134_v34 }
 0x123   : > { %v691_v41 = vpop.permute.xlu1 %690 }
 0x124   : > { %995 = vrot.lane.b32.xlu0 %v987_v0, %s4747_s13 }
 0x125   : > { %778 = vrot.lane.b32.xlu1 %v769_v5, %s3943_s27 }
 0x127   : > { %v772_v43 = vpop.permute.xlu1 %771 }
 0x128   : > { %999 = vrot.lane.b32.xlu0 %v989_v7, %s4747_s13 }
 0x129   : > { %620 = vrot.lane.b32.xlu1 %v540_v10, %s4739_s14  ;;  %s4760_s14 = smov 16  }
 0x12c   : > { %699 = vrot.lane.b32.xlu0 %v689_v12, %s4741_s30  ;;  %s4759_s30 = smov 17  }
 0x12d   : > { %914 = vrot.lane.b32.xlu1 %v906_v15, %s4745_s23 }
 0x12e   : > { %v696_v42 = vpop.permute.xlu0 %695 }
 0x130   : > { %780 = vrot.lane.b32.xlu0 %v770_v16, %s3943_s27 }
 0x131   : > { %918 = vrot.lane.b32.xlu1 %v908_v18, %s4745_s23 }
 0x132   : > { %v777_v44 = vpop.permute.xlu0 %776 }
 0x134   : > { %990 = vrot.lane.b32.xlu0 %v4195_v22, %s4733_s28  ;;  %s4743_s28 = smov 64  }
 0x135   : > { %909 = vrot.lane.b32.xlu1 %v4195_v22, %s3952_s17  ;;  %s4757_s17 = smov 111  }
 0x136   : > { %v617_v45 = vpop.permute.xlu1 %616 }
 0x138   : > { %916 = vrot.lane.b32.xlu0 %v907_v23, %s4745_s23 }
 0x139   : > { %1064 = vrot.lane.b32.xlu1 %v4218_v52, %s3949_s18 }
 0x13c   : > { %1066 = vrot.lane.b32.xlu0 %v4223_v53, %s3949_s18 }
 0x13d   : > { %997 = vrot.lane.b32.xlu1 %v988_v29, %s4747_s13 }
 0x140   : > { %1144 = vrot.lane.b32.xlu0 %v1136_v33, %s4757_s17 }
 0x141   : > { %1068 = vrot.lane.b32.xlu1 %v1058_v32, %s3949_s18 }
 0x144   : > { %1148 = vrot.lane.b32.xlu0 %v1138_v35, %s4757_s17 }
 0x145   : > { %1146 = vrot.lane.b32.xlu1 %v1137_v36, %s4757_s17 }
 0x148   : > { %1139 = vrot.lane.b32.xlu0 %v4195_v22, %s4743_s28  ;;  %s4763_s28 = smov 127  }
 0x149   : > { %1059 = vrot.lane.b32.xlu1 %v4195_v22, %s3954_s29  ;;  %s4758_s29 = smov 15  }
 0x14c   : > { %1223 = vperm.xlu0 %3834, %v1220_v24   ;;  %v1287_v24 = vld [vmem:[%s4717_s6] ss:$2 sm:$0x3] }
 0x14d   : > { %1208 = vperm.xlu1 %3835, %v1205_v37   ;;  %v3510_v37 = vld [vmem:[%s4717_s6 + $0x1] ss:$2 sm:$0x3] }
 0x18e   : > { %v555_v46 = vpop.permute.xlu0 %554 }
 0x18f   : > { %v557_v22 = vpop.permute.xlu1 %556  ;;  %v559_v47 = vsel %vm446_vm1, %v553_v39, %v555_v46  ;;  %v1296_v39 = vrot.slane %v1287_v24, %v4151_v3 }
 0x190   : > { %v560_v48 = vsel %vm446_vm1, %v555_v46, %v557_v22  ;;  %v567_v49 = vsel %vm565_vm10, %v559_v47, 0 }
 0x191   : > { %3490 = vmatprep.subr.msk.bf16.mxu1 %vm565_vm10, %v560_v48  ;;  %1313 = vrot.lane.b32.xlu0 %v1296_v39, %s4757_s17 }
 0x192   : > { %573 = vmatpush1.bf16.msra.mxu1 %v567_v49  ;;  %v619_v50 = vpop.permute.xlu0 %618 }
 0x193   : > { %v698_v51 = vpop.permute.xlu1 %697  ;;  %v623_v56 = vsel %vm497_vm3, %v617_v45, %v619_v50 }
 0x194   : > { %v702_v60 = vsel %vm701_vm9, %v696_v42, %v698_v51  ;;  %v629_v61 = vsel %vm565_vm10, %v623_v56, 0  ;;  %v4351_v42 = vld [vmem:[#allocation2] sm:$0xf] }
 0x195   : > { %3491 = vmatmul.mubr.msk.bf16.vlgmr.msra.gmra.mrb[0].mxu1 %vm561_vm11, %v548_v38  ;;  %v708_v5 = vsel %vm565_vm10, %v702_v60, 0  ;;  %v1292_v38 = vrot.slane %v1287_v24, %v4154_v4 }
 0x196   : > { %v996_v54 = vpop.permute.xlu0 %995  ;;  %745 = vmatprep.mubr.bf16.mxu1 %v3938_v1 }
 0x197   : > { %v779_v55 = vpop.permute.xlu1 %778  ;;  %1311 = vrot.lane.b32.xlu1 %v1292_v38, %s4757_s17 }
 0x198   : > { %v783_v6 = vsel %vm782_vm8, %v777_v44, %v779_v55 }
 0x199   : > { %v789_v10 = vsel %vm565_vm10, %v783_v6, 0 }
 0x19a   : > { %v1000_v57 = vpop.permute.xlu0 %999 }
 0x19b   : > { %v621_v58 = vpop.permute.xlu1 %620 }
 0x19c   : > { %v624_v59 = vsel %vm497_vm3, %v619_v50, %v621_v58 }
 0x19d   : > { %3492 = vmatprep.subr.msk.bf16.mxu0 %vm565_vm10, %v624_v59 }
 0x19e   : > { %635 = vmatpush1.bf16.msra.mxu0 %v629_v61  ;;  %v700_v62 = vpop.permute.xlu0 %699 }
 0x19f   : > { %v703_v63 = vsel %vm701_vm9, %v698_v51, %v700_v62  ;;  %v915_v0 = vpop.permute.xlu1 %914 }
 0x1a0   : > { %3494 = vmatprep.subr.msk.bf16.mxu1 %vm565_vm10, %v703_v63 }
 0x1a1   : > { %3493 = vmatmul.mubr.msk.bf16.vlgmr.msra.gmra.mrb[4].mxu0 %vm561_vm11, %v4191_v21  ;;  %714 = vmatpush1.bf16.msra.mxu1 %v708_v5 }
 0x1a2   : > { %3498 = vmatprep.subr.msk.bf16.mxu1 %vm565_vm10, %v4223_v53  ;;  %v781_v7 = vpop.permute.xlu0 %780  ;;  %826 = vmatprep.mubr.bf16.mxu0 %v3938_v1 }
 0x1a3   : > { %v784_v8 = vsel %vm782_vm8, %v779_v55, %v781_v7  ;;  %v919_v9 = vpop.permute.xlu1 %918 }
 0x1a4   : > { %3495 = vmatmul.mubr.msk.bf16.vlgmr.msra.gmra.mrb[4].mxu1 %vm561_vm11, %v691_v41  ;;  %3496 = vmatprep.subr.msk.bf16.mxu0 %vm565_vm10, %v784_v8  ;;  %v1307_v41 = vrot.slane %v3510_v37, %v4151_v3  ;;  %v1325_v3 = vpack.c.bf16 %v4351_v42, %v4351_v42 }
 0x1a5   : > { %795 = vmatpush1.bf16.msra.mxu0 %v789_v10  ;;  %849 = vmatpush1.bf16.msra.mxu1 %v843_v11 }
 0x1a6   : > { %v991_v21 = vpop.permute.xlu0 %990  ;;  %880 = vmatprep.mubr.bf16.mxu1 %v3938_v1  ;;  %1467 = vrot.lane.b32.xlu0 %v1307_v41, %s4747_s13 }
 0x1a7   : > { %v910_v53 = vpop.permute.xlu1 %909 }
 0x1a9   : > { %3497 = vmatmul.mubr.msk.bf16.vlgmr.msra.gmra.mrb[8].mxu0 %vm561_vm11, %v772_v43 }
 0x1aa   : > { %v917_v12 = vpop.permute.xlu0 %916  ;;  %964 = vmatprep.mubr.bf16.mxu0 %v3938_v1  ;;  %1549 = vrot.lane.b32.xlu0 %v1296_v39, %s4745_s23 }
 0x1ab   : > { %v921_v14 = vsel %vm760_vm7, %v915_v0, %v917_v12  ;;  %v922_v15 = vsel %vm760_vm7, %v917_v12, %v919_v9  ;;  %v1065_v16 = vpop.permute.xlu1 %1064 }
 0x1ac   : > { %v927_v17 = vsel %vm565_vm10, %v921_v14, 0  ;;  %3499 = vmatmul.mubr.msk.bf16.vlgmr.msra.gmra.mrb[8].mxu1 %vm561_vm11, %v838_v40  ;;  %3500 = vmatprep.subr.msk.bf16.mxu0 %vm565_vm10, %v922_v15  ;;  %v1303_v40 = vrot.slane %v3510_v37, %v4154_v4 }
 0x1ad   : > { %933 = vmatpush1.bf16.msra.mxu0 %v927_v17  ;;  %1045 = vmatprep.mubr.bf16.mxu1 %v3938_v1 }
 0x1ae   : > { %v1067_v52 = vpop.permute.xlu0 %1066  ;;  %1465 = vrot.lane.b32.xlu1 %v1303_v40, %s4747_s13  ;;  %1689 = vrot.lane.b32.xlu0 %v1307_v41, %s3943_s27  ;;  %s4761_s13 = smov 120  }
 0x1af   : > { %v998_v18 = vpop.permute.xlu1 %997  ;;  %v1071_v25 = vsel %vm1070_vm12, %v1065_v16, %v1067_v52 }
 0x1b0   : > { %v1002_v19 = vsel %vm679_vm6, %v996_v54, %v998_v18  ;;  %v1003_v20 = vsel %vm679_vm6, %v998_v18, %v1000_v57  ;;  %v1077_v29 = vsel %vm565_vm10, %v1071_v25, 0 }
 0x1b1   : > { %v1008_v23 = vsel %vm565_vm10, %v1002_v19, 0  ;;  %3501 = vmatmul.mubr.msk.bf16.vlgmr.msra.gmra.mrb[12].mxu0 %vm561_vm11, %v910_v53  ;;  %3502 = vmatprep.subr.msk.bf16.mxu1 %vm565_vm10, %v1003_v20 }
 0x1b2   : > { %1014 = vmatpush1.bf16.msra.mxu1 %v1008_v23  ;;  %v1145_v26 = vpop.permute.xlu0 %1144  ;;  %1114 = vmatprep.mubr.bf16.mxu0 %v3938_v1 }
 0x1b3   : > { %v1069_v27 = vpop.permute.xlu1 %1068  ;;  %1547 = vrot.lane.b32.xlu1 %v1292_v38, %s4745_s23  ;;  %1771 = vrot.lane.b32.xlu0 %v1296_v39, %s4758_s29  ;;  %s4762_s23 = smov 113  }
 0x1b4   : > { %v1072_v28 = vsel %vm1070_vm12, %v1067_v52, %v1069_v27 }
 0x1b5   : > { %3503 = vmatmul.mubr.msk.bf16.vlgmr.msra.gmra.mrb[12].mxu1 %vm561_vm11, %v991_v21  ;;  %3504 = vmatprep.subr.msk.bf16.mxu0 %vm565_vm10, %v1072_v28 }
 0x1b6   : > { %1083 = vmatpush1.bf16.msra.mxu0 %v1077_v29  ;;  %v1149_v30 = vpop.permute.xlu0 %1148  ;;  %1194 = vmatprep.mubr.bf16.mxu1 %v3938_v1  ;;  %v3955_v29 = vmov 1983009808  }
 0x1b7   : > { %v1147_v31 = vpop.permute.xlu1 %1146  ;;  %1687 = vrot.lane.b32.xlu1 %v1303_v40, %s3943_s27  ;;  %1924 = vrot.lane.b32.xlu0 %v1307_v41, %s4759_s30 }
 0x1b8   : > { %v1151_v32 = vsel %vm530_vm5, %v1145_v26, %v1147_v31  ;;  %v1152_v33 = vsel %vm530_vm5, %v1147_v31, %v1149_v30  ;;  %v1330_v30 = vunpack.c.l.s4 %v3955_v29 }
 0x1b9   : > { %v1157_v34 = vsel %vm565_vm10, %v1151_v32, 0  ;;  %3506 = vmatprep.subr.msk.bf16.mxu1 %vm565_vm10, %v1152_v33 }
 0x1ba   : > { %1163 = vmatpush1.bf16.msra.mxu1 %v1157_v34  ;;  %v1140_v35 = vpop.permute.xlu0 %1139  ;;  %v1331_v39 = vunpack.c.0.s8 %v1330_v30 }
 0x1bb   : > { %v1060_v36 = vpop.permute.xlu1 %1059  ;;  %1769 = vrot.lane.b32.xlu1 %v1292_v38, %s4758_s29 }
 0x1bc   : > { %3505 = vmatmul.mubr.msk.bf16.vlgmr.msra.gmra.mrb[16].mxu0 %vm561_vm11, %v1060_v36 }
 0x1bd   : > { %3507 = vmatmul.mubr.msk.bf16.vlgmr.msra.gmra.mrb[16].mxu1 %vm561_vm11, %v1140_v35  ;;  %1267 = vmatprep.mubr.bf16.mxu0 %v3938_v1 }
 0x1be   : > { %1392 = vmatprep.mubr.bf16.mxu1 %v3938_v1 }
 0x1bf   : > { %1922 = vrot.lane.b32.xlu1 %v1303_v40, %s4759_s30 }
 0x1c3   : > { %1341 = vrot.lane.b32.xlu1 %v1325_v3, %s4760_s14 }
 0x1cc   : > { %v1209_v25 = vpop.permute.xlu1 %1208 }
 0x209   : > { %v1312_v3 = vpop.permute.xlu1 %1311 }
 0x268   : > { %v606_v4 = vpop.f32.mrb[0].mxu1 }
 0x269   : > { %v608_v43 = vpop.f32.mrb[1].mxu1 }
 0x26a   : > { %v610_v44 = vpop.f32.mrb[2].mxu1 }
 0x26b   : > { %v611_v45 = vpop.f32.mrb[3].mxu1 }
 0x26c   : > { %v1334_v45 = vsub.s32 %v1331_v39, %v4146_v2  ;;  %v1217_v2 = vld [vmem:[%s4718_s7] sm:$0x3] }
 0x274   : > { %v668_v46 = vpop.f32.mrb[4].mxu0 }
 0x275   : > { %v669_v22 = vadd.f32 %v668_v46, %v606_v4  ;;  %v670_v47 = vpop.f32.mrb[5].mxu0 }
 0x276   : > { %v671_v48 = vadd.f32 %v670_v47, %v608_v43  ;;  %v672_v49 = vpop.f32.mrb[6].mxu0  ;;  %v1319_v43 = vmul.f32 %v1312_v3, %v4351_v42  ;;  %v4363_v47 = vld [vmem:[%s4720_s9] sm:$0x3] }
 0x277   : > { %v673_v50 = vpop.f32.mrb[7].mxu0  ;;  %v747_v51 = vpop.f32.mrb[4].mxu1  ;;  %v1462_v42 = vld [vmem:[#allocation2] sm:$0xf] }
 0x278   : > { %v754_v54 = vadd.f32 %v747_v51, %v669_v22  ;;  %v749_v55 = vpop.f32.mrb[5].mxu1  ;;  %v1322_v22 = vpack.c.bf16 %v1319_v43, %v1319_v43  ;;  %v4368_v51 = vrot.slane %v4363_v47, %v1334_v45 }
 0x279   : > { %v755_v56 = vadd.f32 %v749_v55, %v671_v48  ;;  %v751_v57 = vpop.f32.mrb[6].mxu1 }
 0x27a   : > { %v752_v58 = vpop.f32.mrb[7].mxu1  ;;  %1404 = vrot.lane.b32.xlu1 %v1322_v22, %s4759_s30  ;;  %1336 = vrot.lane.b32.xlu0 %v4368_v51, %s3956_s20  ;;  %v1544_v57 = vld [vmem:[#allocation2] sm:$0xf]  ;;  %s3962_s20 = smov 32  }
 0x27c   : > { %v828_v59 = vpop.f32.mrb[8].mxu0 }
 0x27d   : > { %v835_v60 = vadd.f32 %v828_v59, %v754_v54  ;;  %v830_v61 = vpop.f32.mrb[9].mxu0  ;;  %v1466_v54 = vpop.permute.xlu1 %1465 }
 0x27e   : > { %v836_v62 = vadd.f32 %v830_v61, %v755_v56  ;;  %v832_v63 = vpop.f32.mrb[10].mxu0  ;;  %1479 = vrot.lane.b32.xlu1 %v4368_v51, %s4761_s13  ;;  %v1473_v55 = vmul.f32 %v1466_v54, %v1462_v42  ;;  %s3957_s13 = smov 116   ;;  %v1224_v61 = vpop.permute.xlu0 %1223 }
 0x27f   : > { %v833_v0 = vpop.f32.mrb[11].mxu0  ;;  %v882_v5 = vpop.f32.mrb[8].mxu1 }
 0x280   : > { %v889_v6 = vadd.f32 %v882_v5, %v835_v60  ;;  %v884_v7 = vpop.f32.mrb[9].mxu1  ;;  %v1476_v56 = vpack.c.bf16 %v1473_v55, %v1473_v55 }
 0x281   : > { %v890_v8 = vadd.f32 %v884_v7, %v836_v62  ;;  %v886_v9 = vpop.f32.mrb[10].mxu1  ;;  %v1548_v58 = vpop.permute.xlu1 %1547 }
 0x282   : > { %v887_v10 = vpop.f32.mrb[11].mxu1  ;;  %v1555_v59 = vmul.f32 %v1548_v58, %v1544_v57  ;;  %1484 = vrot.lane.b32.xlu0 %v1476_v56, %s4758_s29  ;;  %1561 = vrot.lane.b32.xlu1 %v4368_v51, %s3957_s13  ;;  %v1314_v62 = vpop.permute.xlu0 %1313  ;;  %s3963_s13 = smov 48  }
 0x284   : > { %v966_v11 = vpop.f32.mrb[12].mxu0  ;;  %v1558_v60 = vpack.c.bf16 %v1555_v59, %v1555_v59 }
 0x285   : > { %v973_v21 = vadd.f32 %v966_v11, %v889_v6  ;;  %v968_v53 = vpop.f32.mrb[13].mxu0 }
 0x286   : > { %v974_v12 = vadd.f32 %v968_v53, %v890_v8  ;;  %v970_v14 = vpop.f32.mrb[14].mxu0  ;;  %1566 = vrot.lane.b32.xlu0 %v1558_v60, %s3943_s27 }
 0x287   : > { %v971_v15 = vpop.f32.mrb[15].mxu0  ;;  %v1688_v14 = vpop.permute.xlu1 %1687 }
 0x288   : > { %v1047_v16 = vpop.f32.mrb[12].mxu1 }
 0x289   : > { %v1054_v17 = vadd.f32 %v1047_v16, %v973_v21  ;;  %v1049_v52 = vpop.f32.mrb[13].mxu1  ;;  %v1468_v21 = vpop.permute.xlu0 %1467 }
 0x28a   : > { %v1055_v18 = vadd.f32 %v1049_v52, %v974_v12  ;;  %v1051_v19 = vpop.f32.mrb[14].mxu1  ;;  %1630 = vrot.lane.b32.xlu0 %v4368_v51, %s3949_s18  ;;  %v1315_v52 = vsel %vm530_vm5, %v1312_v3, %v1314_v62 }
 0x28b   : > { %v1052_v20 = vpop.f32.mrb[15].mxu1  ;;  %v1469_v19 = vsel %vm679_vm6, %v1466_v54, %v1468_v21  ;;  %v1770_v30 = vpop.permute.xlu1 %1769 }
 0x28d   : > { %v1550_v12 = vpop.permute.xlu0 %1549 }
 0x28e   : > { %v1551_v29 = vsel %vm760_vm7, %v1548_v58, %v1550_v12 }
 0x28f   : > { %v1116_v23 = vpop.f32.mrb[16].mxu0 }
 0x290   : > { %v1123_v26 = vadd.f32 %v1116_v23, %v1054_v17  ;;  %v1118_v27 = vpop.f32.mrb[17].mxu0  ;;  %v1196_v28 = vpop.f32.mrb[16].mxu1 }
 0x291   : > { %v1124_v31 = vadd.f32 %v1118_v27, %v1055_v18  ;;  %v1120_v32 = vpop.f32.mrb[18].mxu0  ;;  %v1198_v33 = vpop.f32.mrb[17].mxu1 }
 0x292   : > { %v1203_v34 = vadd.f32 %v1196_v28, %v1123_v26  ;;  %v1121_v35 = vpop.f32.mrb[19].mxu0  ;;  %v1200_v36 = vpop.f32.mrb[18].mxu1 }
 0x293   : > { %v1204_v24 = vadd.f32 %v1198_v33, %v1124_v31  ;;  %v1201_v37 = vpop.f32.mrb[19].mxu1  ;;  %v1690_v18 = vpop.permute.xlu0 %1689  ;;  %v1768_v31 = vld [vmem:[#allocation2 + $0x18] sm:$0xf] }
 0x294   : > { %v1211_v38 = vadd.f32 %v1209_v25, %v1203_v34  ;;  %v1691_v55 = vsel %vm782_vm8, %v1688_v14, %v1690_v18 }
 0x295   : > { %v1212_v40 = vadd.f32 %v1209_v25, %v1204_v24 }
 0x296   : > { %v1213_v41 = vmul.f32 0.01, %v1211_v38 }
 0x297   : > { %v1214_v4 = vmul.f32 0.01, %v1212_v40  ;;  %v1772_v36 = vpop.permute.xlu0 %1771 }
 0x298   : > { %v1215_v44 = vmax.f32 %v1211_v38, %v1213_v41  ;;  %v1779_v24 = vmul.f32 %v1772_v36, %v1768_v31  ;;  %v1773_v58 = vsel %vm701_vm9, %v1770_v30, %v1772_v36 }
 0x299   : > { %v1216_v46 = vmax.f32 %v1212_v40, %v1214_v4 }
 0x29a   : > { %v1218_v48 = vpack.c.bf16 %v1215_v44, %v1215_v44  ;;  %v1782_v3 = vpack.c.bf16 %v1779_v24, %v1779_v24 }
 0x29b   : > { %v1219_v49 = vpack.c.bf16 %v1216_v46, %v1216_v46  ;;  %v1686_v46 = vld [vmem:[#allocation2 + $0x18] sm:$0xf] }
 0x29c   : > { %v1230_v50 = vsel %vm565_vm10, %v1218_v48, 0 }
 0x29d   : > { %3508 = vmatprep.subr.msk.bf16.mxu0 %vm565_vm10, %v1219_v49  ;;  %v1697_v49 = vmul.f32 %v1690_v18, %v1686_v46  ;;  %v2001_v18 = vld [vmem:[%s4721_s10] sm:$0xf] }
 0x29e   : > { %1236 = vmatpush1.bf16.msra.mxu0 %v1230_v50 }
 0x29f   : > { %v1700_v42 = vpack.c.bf16 %v1697_v49, %v1697_v49 }
 0x2a1   : > { %3509 = vmatmul.mubr.msk.bf16.vlgmr.msra.gmra.mrb[20].mxu0 %vm561_vm11, %v1217_v2 }
 0x2a2   : > { %1453 = vmatprep.mubr.bf16.mxu0 %v3938_v1 }
 0x374   : > { %v1269_v63 = vpop.f32.mrb[20].mxu0 }
 0x375   : > { %v1270_v0 = vadd.f32 %v1269_v63, %v1224_v61  ;;  %v1271_v5 = vpop.f32.mrb[21].mxu0  ;;  %v1923_v63 = vpop.permute.xlu1 %1922 }
 0x376   : > { %v1272_v6 = vadd.f32 %v1271_v5, %v1224_v61  ;;  %v1273_v7 = vpop.f32.mrb[22].mxu0 }
 0x377   : > { %v1276_v8 = vmul.f32 0.01, %v1270_v0  ;;  %v1274_v9 = vpop.f32.mrb[23].mxu0  ;;  %v1921_v7 = vld [vmem:[#allocation2 + $0x18] sm:$0xf] }
 0x378   : > { %v1277_v10 = vmul.f32 0.01, %v1272_v6 }
 0x379   : > { %v1278_v11 = vmax.f32 %v1270_v0, %v1276_v8  ;;  %v1850_v8 = vld [vmem:[#allocation2 + $0x18] sm:$0xf] }
 0x37a   : > { %v1279_v53 = vmax.f32 %v1272_v6, %v1277_v10  ;;  %v1925_v6 = vpop.permute.xlu0 %1924 }
 0x37b   : > { %1284 = vst [vmem:[#allocation2 + $0x8] sm:$0xf] %v1278_v11 }
 0x37c   : > { %1285 = vst [vmem:[#allocation2 + $0x10] sm:$0xf] %v1279_v53  ;;  %v1926_v53 = vsel %vm497_vm3, %v1923_v63, %v1925_v6 }
 0x382   : > { %v1309_v15 = vld [vmem:[#allocation2 + $0x8] sm:$0xf] }
 0x383   : > { %v1310_v16 = vld [vmem:[#allocation2 + $0x10] sm:$0xf]  ;;  %v1463_v17 = vld [vmem:[#allocation2 + $0x8] sm:$0xf]  ;;  %v1326_v20 = vpack.c.bf16 %v1309_v15, %v1309_v15  ;;  %v1320_v25 = vmul.f32 %v1315_v52, %v1309_v15 }
 0x384   : > { %v1327_v23 = vpack.c.bf16 %v1310_v16, %v1310_v16  ;;  %v1545_v26 = vld [vmem:[#allocation2 + $0x8] sm:$0xf]  ;;  %v1474_v28 = vmul.f32 %v1469_v19, %v1463_v17  ;;  %v1321_v39 = vmul.f32 %v1314_v62, %v1310_v16  ;;  %v1464_v41 = vld [vmem:[#allocation2 + $0x10] sm:$0xf]  ;;  %v1337_v19 = vpop.permute.xlu0 %1336 }
 0x385   : > { %v1766_v27 = vld [vmem:[#allocation2 + $0x8] sm:$0xf]  ;;  %1343 = vrot.lane.b32.xlu0 %v1326_v20, %s4760_s14  ;;  %v1556_v32 = vmul.f32 %v1551_v29, %v1545_v26  ;;  %v1323_v34 = vpack.c.bf16 %v1320_v25, %v1320_v25  ;;  %v1475_v44 = vmul.f32 %v1468_v21, %v1464_v41  ;;  %v1546_v45 = vld [vmem:[#allocation2 + $0x10] sm:$0xf]  ;;  %v1342_v20 = vpop.permute.xlu1 %1341 }
 0x386   : > { %1345 = vrot.lane.b32.xlu1 %v1327_v23, %s4760_s14  ;;  %v1777_v33 = vmul.f32 %v1770_v30, %v1766_v27  ;;  %v1477_v35 = vpack.c.bf16 %v1474_v28, %v1474_v28  ;;  %v1684_v40 = vld [vmem:[#allocation2 + $0x8] sm:$0xf]  ;;  %v1324_v43 = vpack.c.bf16 %v1321_v39, %v1321_v39  ;;  %v1557_v22 = vmul.f32 %v1550_v12, %v1546_v45  ;;  %v1685_v54 = vld [vmem:[#allocation2 + $0x10] sm:$0xf] }
 0x387   : > { %v1559_v37 = vpack.c.bf16 %v1556_v32, %v1556_v32  ;;  %v1695_v4 = vmul.f32 %v1688_v14, %v1684_v40  ;;  %v1478_v50 = vpack.c.bf16 %v1475_v44, %v1475_v44  ;;  %v1696_v56 = vmul.f32 %v1691_v55, %v1685_v54  ;;  %v1767_v57 = vld [vmem:[#allocation2 + $0x10] sm:$0xf]  ;;  %v1848_v59 = vld [vmem:[#allocation2 + $0x8] sm:$0xf] }
 0x388   : > { %v1780_v38 = vpack.c.bf16 %v1777_v33, %v1777_v33  ;;  %v1560_v2 = vpack.c.bf16 %v1557_v22, %v1557_v22  ;;  %v1778_v61 = vmul.f32 %v1773_v58, %v1767_v57  ;;  %v1851_v62 = vpack.c.bf16 %v1848_v59, %v1848_v59  ;;  %v1919_v0 = vld [vmem:[#allocation2 + $0x8] sm:$0xf]  ;;  %v1849_v5 = vld [vmem:[#allocation2 + $0x10] sm:$0xf]  ;;  %v1485_v23 = vpop.permute.xlu0 %1484 }
 0x389   : > { %1406 = vrot.lane.b32.xlu0 %v1323_v34, %s4759_s30  ;;  %v1698_v48 = vpack.c.bf16 %v1695_v4, %v1695_v4  ;;  %v1699_v60 = vpack.c.bf16 %v1696_v56, %v1696_v56  ;;  %v1930_v10 = vmul.f32 %v1923_v63, %v1919_v0  ;;  %v1852_v11 = vpack.c.bf16 %v1849_v5, %v1849_v5  ;;  %v1920_v21 = vld [vmem:[#allocation2 + $0x10] sm:$0xf]  ;;  %v1405_v25 = vpop.permute.xlu1 %1404 }
 0x38a   : > { %1486 = vrot.lane.b32.xlu1 %v1477_v35, %s4758_s29  ;;  %v1781_v9 = vpack.c.bf16 %v1778_v61, %v1778_v61  ;;  %v1932_v12 = vmul.f32 %v1925_v6, %v1921_v7  ;;  %v1853_v14 = vpack.c.bf16 %v1850_v8, %v1850_v8  ;;  %v1931_v16 = vmul.f32 %v1926_v53, %v1920_v21  ;;  %v1627_v4 = vld [vmem:[#allocation2 + $0x10] sm:$0xf] }
 0x38b   : > { %v1933_v15 = vpack.c.bf16 %v1930_v10, %v1930_v10 }
 0x38c   : > { %v1935_v17 = vpack.c.bf16 %v1932_v12, %v1932_v12  ;;  %v1934_v52 = vpack.c.bf16 %v1931_v16, %v1931_v16  ;;  %v1567_v26 = vpop.permute.xlu0 %1566 }
 0x38d   : > { %1788 = vrot.lane.b32.xlu0 %v1780_v38, %s4762_s23  ;;  %v1480_v27 = vpop.permute.xlu1 %1479 }
 0x38e   : > { %1568 = vrot.lane.b32.xlu1 %v1559_v37, %s3943_s27 }
 0x390   : > { %v1631_v28 = vpop.permute.xlu0 %1630 }
 0x391   : > { %1792 = vrot.lane.b32.xlu0 %v1782_v3, %s4762_s23  ;;  %v1562_v29 = vpop.permute.xlu1 %1561 }
 0x392   : > { %1408 = vrot.lane.b32.xlu1 %v1324_v43, %s4759_s30  ;;  %s4764_s30 = smov 104   ;;  %v1626_v43 = vld [vmem:[#allocation2 + $0x8] sm:$0xf] }
 0x393   : > { %v1628_v49 = vpack.c.bf16 %v1626_v43, %v1626_v43 }
 0x395   : > { %1488 = vrot.lane.b32.xlu0 %v1478_v50, %s4758_s29  ;;  %s3958_s29 = smov 108  }
 0x396   : > { %1706 = vrot.lane.b32.xlu1 %v1698_v48, %s4763_s28  ;;  %v1629_v48 = vpack.c.bf16 %v1627_v4, %v1627_v4 }
 0x399   : > { %1570 = vrot.lane.b32.xlu0 %v1560_v2, %s3943_s27  ;;  %s3959_s27 = smov 100  }
 0x39a   : > { %1710 = vrot.lane.b32.xlu1 %v1700_v42, %s4763_s28 }
 0x39d   : > { %1783 = vrot.lane.b32.xlu0 %v4368_v51, %s4764_s30 }
 0x39e   : > { %1701 = vrot.lane.b32.xlu1 %v4368_v51, %s3958_s29  ;;  %s4766_s29 = smov 64  }
 0x3a1   : > { %1708 = vrot.lane.b32.xlu0 %v1699_v60, %s4763_s28 }
 0x3a2   : > { %1859 = vrot.lane.b32.xlu1 %v1851_v62, %s3949_s18 }
 0x3a5   : > { %1861 = vrot.lane.b32.xlu0 %v1852_v11, %s3949_s18 }
 0x3a6   : > { %1790 = vrot.lane.b32.xlu1 %v1781_v9, %s4762_s23 }
 0x3a9   : > { %1941 = vrot.lane.b32.xlu0 %v1933_v15, %s4757_s17 }
 0x3aa   : > { %1863 = vrot.lane.b32.xlu1 %v1853_v14, %s3949_s18 }
 0x3ad   : > { %1945 = vrot.lane.b32.xlu0 %v1935_v17, %s4757_s17 }
 0x3ae   : > { %1943 = vrot.lane.b32.xlu1 %v1934_v52, %s4757_s17 }
 0x3b1   : > { %1936 = vrot.lane.b32.xlu0 %v4368_v51, %s4765_s19 }
 0x3b2   : > { %1854 = vrot.lane.b32.xlu1 %v4368_v51, %s3959_s27  ;;  %s4767_s27 = smov 80  }
 0x3b6   : > { %2004 = vperm.xlu1 %3835, %v2001_v18   ;;  %v2014_v18 = vld [vmem:[%s4722_s11 + $0x8] sm:$0xff] }
 0x3f7   : > { %v1344_v30 = vpop.permute.xlu0 %1343 }
 0x3f8   : > { %v1346_v31 = vpop.permute.xlu1 %1345  ;;  %v1347_v32 = vsel %vm446_vm1, %v1342_v20, %v1344_v30 }
 0x3f9   : > { %v1348_v51 = vsel %vm446_vm1, %v1344_v30, %v1346_v31  ;;  %v1355_v33 = vsel %vm1353_vm13, %v1347_v32, 0 }
 0x3fa   : > { %3511 = vmatprep.subr.msk.bf16.mxu1 %vm1353_vm13, %v1348_v51 }
 0x3fb   : > { %1361 = vmatpush1.bf16.msra.mxu1 %v1355_v33  ;;  %v1407_v34 = vpop.permute.xlu0 %1406 }
 0x3fc   : > { %v1487_v35 = vpop.permute.xlu1 %1486  ;;  %v1410_v37 = vsel %vm497_vm3, %v1405_v25, %v1407_v34 }
 0x3fd   : > { %v1416_v41 = vsel %vm1353_vm13, %v1410_v37, 0  ;;  %v1490_v3 = vsel %vm701_vm9, %v1485_v23, %v1487_v35 }
 0x3fe   : > { %3512 = vmatmul.mubr.msk.bf16.vlgmr.msra.gmra.mrb[20].mxu1 %vm1349_vm14, %v1337_v19  ;;  %v1496_v22 = vsel %vm1353_vm13, %v1490_v3, 0  ;;  %v3960_v19 = vmov 0.0|0.0  }
 0x3ff   : > { %1533 = vmatprep.mubr.bf16.mxu1 %v3938_v1  ;;  %v1789_v36 = vpop.permute.xlu0 %1788 }
 0x400   : > { %v1569_v24 = vpop.permute.xlu1 %1568 }
 0x401   : > { %v1572_v50 = vsel %vm782_vm8, %v1567_v26, %v1569_v24 }
 0x402   : > { %v1578_v55 = vsel %vm1353_vm13, %v1572_v50, 0 }
 0x403   : > { %v1793_v38 = vpop.permute.xlu0 %1792 }
 0x404   : > { %v1409_v39 = vpop.permute.xlu1 %1408 }
 0x405   : > { %v1411_v40 = vsel %vm497_vm3, %v1407_v34, %v1409_v39  ;;  %vm2263_vm3 = vcmask 1044224  }
 0x406   : > { %3513 = vmatprep.subr.msk.bf16.mxu0 %vm1353_vm13, %v1411_v40 }
 0x407   : > { %1422 = vmatpush1.bf16.msra.mxu0 %v1416_v41  ;;  %v1489_v44 = vpop.permute.xlu0 %1488 }
 0x408   : > { %v1707_v45 = vpop.permute.xlu1 %1706  ;;  %v1491_v46 = vsel %vm701_vm9, %v1487_v35, %v1489_v44 }
 0x409   : > { %3515 = vmatprep.subr.msk.bf16.mxu1 %vm1353_vm13, %v1491_v46 }
 0x40a   : > { %3514 = vmatmul.mubr.msk.bf16.vlgmr.msra.gmra.mrb[24].mxu0 %vm1349_vm14, %v4363_v47  ;;  %1502 = vmatpush1.bf16.msra.mxu1 %v1496_v22  ;;  %v1636_v47 = vsel %vm1353_vm13, %v1628_v49, 0 }
 0x40b   : > { %1615 = vmatprep.mubr.bf16.mxu0 %v3938_v1  ;;  %3519 = vmatprep.subr.msk.bf16.mxu1 %vm1353_vm13, %v1629_v48  ;;  %v1571_v2 = vpop.permute.xlu0 %1570 }
 0x40c   : > { %v1711_v42 = vpop.permute.xlu1 %1710  ;;  %v1573_v54 = vsel %vm782_vm8, %v1569_v24, %v1571_v2 }
 0x40d   : > { %3516 = vmatmul.mubr.msk.bf16.vlgmr.msra.gmra.mrb[24].mxu1 %vm1349_vm14, %v1480_v27  ;;  %3517 = vmatprep.subr.msk.bf16.mxu0 %vm1353_vm13, %v1573_v54 }
 0x40e   : > { %1584 = vmatpush1.bf16.msra.mxu0 %v1578_v55  ;;  %1642 = vmatpush1.bf16.msra.mxu1 %v1636_v47 }
 0x40f   : > { %v1784_v56 = vpop.permute.xlu0 %1783  ;;  %1673 = vmatprep.mubr.bf16.mxu1 %v3938_v1 }
 0x410   : > { %v1702_v57 = vpop.permute.xlu1 %1701 }
 0x412   : > { %3518 = vmatmul.mubr.msk.bf16.vlgmr.msra.gmra.mrb[28].mxu0 %vm1349_vm14, %v1562_v29 }
 0x413   : > { %1755 = vmatprep.mubr.bf16.mxu0 %v3938_v1  ;;  %v1709_v58 = vpop.permute.xlu0 %1708 }
 0x414   : > { %v1860_v59 = vpop.permute.xlu1 %1859  ;;  %v1712_v60 = vsel %vm760_vm7, %v1707_v45, %v1709_v58  ;;  %v1713_v61 = vsel %vm760_vm7, %v1709_v58, %v1711_v42 }
 0x415   : > { %v1718_v62 = vsel %vm1353_vm13, %v1712_v60, 0  ;;  %3520 = vmatmul.mubr.msk.bf16.vlgmr.msra.gmra.mrb[28].mxu1 %vm1349_vm14, %v1631_v28  ;;  %3521 = vmatprep.subr.msk.bf16.mxu0 %vm1353_vm13, %v1713_v61 }
 0x416   : > { %1724 = vmatpush1.bf16.msra.mxu0 %v1718_v62  ;;  %1837 = vmatprep.mubr.bf16.mxu1 %v3938_v1 }
 0x417   : > { %v1862_v63 = vpop.permute.xlu0 %1861 }
 0x418   : > { %v1791_v0 = vpop.permute.xlu1 %1790  ;;  %v1865_v8 = vsel %vm1070_vm12, %v1860_v59, %v1862_v63 }
 0x419   : > { %v1794_v5 = vsel %vm679_vm6, %v1789_v36, %v1791_v0  ;;  %v1795_v6 = vsel %vm679_vm6, %v1791_v0, %v1793_v38  ;;  %v1871_v21 = vsel %vm1353_vm13, %v1865_v8, 0 }
 0x41a   : > { %v1800_v7 = vsel %vm1353_vm13, %v1794_v5, 0  ;;  %3522 = vmatmul.mubr.msk.bf16.vlgmr.msra.gmra.mrb[32].mxu0 %vm1349_vm14, %v1702_v57  ;;  %3523 = vmatprep.subr.msk.bf16.mxu1 %vm1353_vm13, %v1795_v6 }
 0x41b   : > { %1806 = vmatpush1.bf16.msra.mxu1 %v1800_v7  ;;  %1908 = vmatprep.mubr.bf16.mxu0 %v3938_v1  ;;  %v1942_v9 = vpop.permute.xlu0 %1941 }
 0x41c   : > { %v1864_v10 = vpop.permute.xlu1 %1863 }
 0x41d   : > { %v1866_v11 = vsel %vm1070_vm12, %v1862_v63, %v1864_v10 }
 0x41e   : > { %3524 = vmatmul.mubr.msk.bf16.vlgmr.msra.gmra.mrb[32].mxu1 %vm1349_vm14, %v1784_v56  ;;  %3525 = vmatprep.subr.msk.bf16.mxu0 %vm1353_vm13, %v1866_v11 }
 0x41f   : > { %1877 = vmatpush1.bf16.msra.mxu0 %v1871_v21  ;;  %1990 = vmatprep.mubr.bf16.mxu1 %v3938_v1  ;;  %v1946_v12 = vpop.permute.xlu0 %1945  ;;  %v2013_v1 = vld [vmem:[%s4722_s11] sm:$0xff] }
 0x420   : > { %v1944_v53 = vpop.permute.xlu1 %1943  ;;  %3712 = vmatprep.subr.bf16.mxu0 %v3960_v19  ;;  %v4477_v20 = vpack.c.bf16 %v2014_v18, %v2013_v1 }
 0x421   : > { %v1947_v14 = vsel %vm530_vm5, %v1942_v9, %v1944_v53  ;;  %v1948_v15 = vsel %vm530_vm5, %v1944_v53, %v1946_v12 }
 0x422   : > { %v1953_v16 = vsel %vm1353_vm13, %v1947_v14, 0  ;;  %3527 = vmatprep.subr.msk.bf16.mxu1 %vm1353_vm13, %v1948_v15 }
 0x423   : > { %1959 = vmatpush1.bf16.msra.mxu1 %v1953_v16  ;;  %v1937_v52 = vpop.permute.xlu0 %1936 }
 0x424   : > { %v1855_v17 = vpop.permute.xlu1 %1854  ;;  %3715 = vmatprep.subr.bf16.mxu1 %v3960_v19 }
 0x425   : > { %3526 = vmatmul.mubr.msk.bf16.vlgmr.msra.gmra.mrb[36].mxu0 %vm1349_vm14, %v1855_v17 }
 0x426   : > { %3528 = vmatmul.mubr.msk.bf16.vlgmr.msra.gmra.mrb[36].mxu1 %vm1349_vm14, %v1937_v52  ;;  %3604 = vmatprep.mubr.msk.f32.mxu0 %vm3961_vm15, %v3939_v13 }
 0x427   : > { %3611 = vmatprep.mubr.msk.f32.mxu1 %vm3961_vm15, %v3939_v13  ;;  %3714 = vmatpush3.bf16.msra.mxu0 %v4477_v20 }
 0x428   : > { %3717 = vmatpush3.bf16.msra.mxu1 %v4477_v20  ;;  %3718 = vmatprep.subr.bf16.mxu0 %v3960_v19 }
 0x429   : > { %3721 = vmatprep.subr.bf16.mxu1 %v3960_v19 }
 0x435   : > { %v2005_v11 = vpop.permute.xlu1 %2004 }
 0x4d1   : > { %v1394_v23 = vpop.f32.mrb[20].mxu1 }
 0x4d2   : > { %v1396_v25 = vpop.f32.mrb[21].mxu1 }
 0x4d3   : > { %v1398_v26 = vpop.f32.mrb[22].mxu1 }
 0x4d4   : > { %v1399_v27 = vpop.f32.mrb[23].mxu1 }
 0x4dd   : > { %v1455_v28 = vpop.f32.mrb[24].mxu0 }
 0x4de   : > { %v1456_v29 = vadd.f32 %v1455_v28, %v1394_v23  ;;  %v1457_v30 = vpop.f32.mrb[25].mxu0 }
 0x4df   : > { %v1458_v31 = vadd.f32 %v1457_v30, %v1396_v25  ;;  %v1459_v32 = vpop.f32.mrb[26].mxu0 }
 0x4e0   : > { %v1460_v51 = vpop.f32.mrb[27].mxu0  ;;  %v1535_v33 = vpop.f32.mrb[24].mxu1 }
 0x4e1   : > { %v1542_v34 = vadd.f32 %v1535_v33, %v1456_v29  ;;  %v1537_v35 = vpop.f32.mrb[25].mxu1 }
 0x4e2   : > { %v1543_v36 = vadd.f32 %v1537_v35, %v1458_v31  ;;  %v1539_v24 = vpop.f32.mrb[26].mxu1 }
 0x4e3   : > { %v1540_v37 = vpop.f32.mrb[27].mxu1 }
 0x4e5   : > { %v1617_v38 = vpop.f32.mrb[28].mxu0 }
 0x4e6   : > { %v1624_v39 = vadd.f32 %v1617_v38, %v1542_v34  ;;  %v1619_v40 = vpop.f32.mrb[29].mxu0 }
 0x4e7   : > { %v1625_v41 = vadd.f32 %v1619_v40, %v1543_v36  ;;  %v1621_v3 = vpop.f32.mrb[30].mxu0 }
 0x4e8   : > { %v1622_v4 = vpop.f32.mrb[31].mxu0  ;;  %v1675_v43 = vpop.f32.mrb[28].mxu1 }
 0x4e9   : > { %v1682_v44 = vadd.f32 %v1675_v43, %v1624_v39  ;;  %v1677_v45 = vpop.f32.mrb[29].mxu1 }
 0x4ea   : > { %v1683_v46 = vadd.f32 %v1677_v45, %v1625_v41  ;;  %v1679_v22 = vpop.f32.mrb[30].mxu1 }
 0x4eb   : > { %v1680_v48 = vpop.f32.mrb[31].mxu1 }
 0x4ed   : > { %v1757_v49 = vpop.f32.mrb[32].mxu0 }
 0x4ee   : > { %v1764_v50 = vadd.f32 %v1757_v49, %v1682_v44  ;;  %v1759_v2 = vpop.f32.mrb[33].mxu0 }
 0x4ef   : > { %v1765_v42 = vadd.f32 %v1759_v2, %v1683_v46  ;;  %v1761_v54 = vpop.f32.mrb[34].mxu0 }
 0x4f0   : > { %v1762_v55 = vpop.f32.mrb[35].mxu0 }
 0x4f1   : > { %v1839_v47 = vpop.f32.mrb[32].mxu1 }
 0x4f2   : > { %v1846_v56 = vadd.f32 %v1839_v47, %v1764_v50  ;;  %v1841_v57 = vpop.f32.mrb[33].mxu1 }
 0x4f3   : > { %v1847_v58 = vadd.f32 %v1841_v57, %v1765_v42  ;;  %v1843_v59 = vpop.f32.mrb[34].mxu1 }
 0x4f4   : > { %v1844_v60 = vpop.f32.mrb[35].mxu1 }
 0x4f8   : > { %v1910_v61 = vpop.f32.mrb[36].mxu0 }
 0x4f9   : > { %v1917_v62 = vadd.f32 %v1910_v61, %v1846_v56  ;;  %v1912_v63 = vpop.f32.mrb[37].mxu0  ;;  %v1992_v0 = vpop.f32.mrb[36].mxu1 }
 0x4fa   : > { %v1918_v5 = vadd.f32 %v1912_v63, %v1847_v58  ;;  %v1994_v6 = vpop.f32.mrb[37].mxu1  ;;  %v1914_v7 = vpop.f32.mrb[38].mxu0 }
 0x4fb   : > { %v1999_v8 = vadd.f32 %v1992_v0, %v1917_v62  ;;  %v1915_v9 = vpop.f32.mrb[39].mxu0  ;;  %v1996_v10 = vpop.f32.mrb[38].mxu1 }
 0x4fc   : > { %v2000_v21 = vadd.f32 %v1994_v6, %v1918_v5  ;;  %v1997_v53 = vpop.f32.mrb[39].mxu1 }
 0x4fd   : > { %v2007_v12 = vadd.f32 %v2005_v11, %v1999_v8 }
 0x4fe   : > { %v2008_v16 = vadd.f32 %v2005_v11, %v2000_v21 }
 0x4ff   : > { %v2009_v14 = vmul.f32 0.01, %v2007_v12 }
 0x500   : > { %v2010_v17 = vmul.f32 0.01, %v2008_v16 }
 0x501   : > { %v2011_v15 = vmax.f32 %v2007_v12, %v2009_v14 }
 0x502   : > { %v2012_v52 = vmax.f32 %v2008_v16, %v2010_v17 }
 0x503   : > { %2175 = vrot.lane.b32.xlu1 %v2011_v15, %s4765_s19  ;;  %2088 = vrot.lane.b32.xlu0 %v2011_v15, %s3949_s18 }
 0x504   : > { %3605 = vmatmul.mubr.msk.f32.vlgmr.msra.gmra.mrb[40].mxu0 %vm446_vm1, %v2011_v15 }
 0x505   : > { %3720 = vmatpush3.bf16.msra.mxu0 %v4477_v20  ;;  %3618 = vmatprep.mubr.msk.f32.mxu0 %vm3961_vm15, %v3939_v13 }
 0x506   : > { %3724 = vmatprep.subr.bf16.mxu0 %v3960_v19 }
 0x507   : > { %2349 = vrot.lane.b32.xlu1 %v2011_v15, %s4766_s29  ;;  %2265 = vrot.lane.b32.xlu0 %v2011_v15, %s4767_s27 }
 0x50b   : > { %2521 = vrot.lane.b32.xlu1 %v2011_v15, %s3962_s20  ;;  %2437 = vrot.lane.b32.xlu0 %v2011_v15, %s3963_s13 }
 0x50f   : > { %2609 = vrot.lane.b32.xlu0 %v2011_v15, %s4760_s14  ;;  %2780 = vrot.lane.b32.xlu1 %v2012_v52, %s3949_s18  ;;  %s4768_s18 = sshll.u32 %s4134_s26, 5 }
 0x513   : > { %2864 = vrot.lane.b32.xlu0 %v2012_v52, %s4765_s19  ;;  %2952 = vrot.lane.b32.xlu1 %v2012_v52, %s4767_s27  ;;  %s3964_s27 = smov [#allocation6]  }
 0x517   : > { %3036 = vrot.lane.b32.xlu0 %v2012_v52, %s4766_s29  ;;  %3124 = vrot.lane.b32.xlu1 %v2012_v52, %s3963_s13 }
 0x51b   : > { %3208 = vrot.lane.b32.xlu0 %v2012_v52, %s3962_s20  ;;  %3296 = vrot.lane.b32.xlu1 %v2012_v52, %s4760_s14  ;;  %s4572_s14 = scalar_lea.vmem [#allocation6], %s4768_s18 }
 0x51c   : > { %s3408_s17 = sshll.u32 %s4572_s14, 4  ;;  %s4667_s17 = int_to_ptr.vmem [resolvable:$true] %s3408_s17 }
 0x575   : > { %v2176_v1 = vpop.permute.xlu1 %2175  ;;  %v2089_v18 = vpop.permute.xlu0 %2088 }
 0x576   : > { %3612 = vmatmul.mubr.msk.f32.vlgmr.msra.gmra.mrb[40].mxu1 %vm446_vm1, %v2089_v18  ;;  %3619 = vmatmul.mubr.msk.f32.vlgmr.msra.gmra.mrb[42].mxu0 %vm446_vm1, %v2176_v1 }
 0x577   : > { %3723 = vmatpush3.bf16.msra.mxu1 %v4477_v20  ;;  %3726 = vmatpush3.bf16.msra.mxu0 %v4477_v20 }
 0x578   : > { %3625 = vmatprep.mubr.msk.f32.mxu1 %vm3961_vm15, %v3939_v13  ;;  %3632 = vmatprep.mubr.msk.f32.mxu0 %vm3961_vm15, %v3939_v13 }
 0x579   : > { %v2350_v23 = vpop.permute.xlu1 %2349  ;;  %v2266_v25 = vpop.permute.xlu0 %2265  ;;  %3727 = vmatprep.subr.bf16.mxu1 %v3960_v19  ;;  %3730 = vmatprep.subr.bf16.mxu0 %v3960_v19 }
 0x57a   : > { %3626 = vmatmul.mubr.msk.f32.vlgmr.msra.gmra.mrb[42].mxu1 %vm446_vm1, %v2266_v25  ;;  %3633 = vmatmul.mubr.msk.f32.vlgmr.msra.gmra.mrb[44].mxu0 %vm446_vm1, %v2350_v23 }
 0x57b   : > { %3729 = vmatpush3.bf16.msra.mxu1 %v4477_v20  ;;  %3732 = vmatpush3.bf16.msra.mxu0 %v4477_v20 }
 0x57c   : > { %3639 = vmatprep.mubr.msk.f32.mxu1 %vm3961_vm15, %v3939_v13  ;;  %3646 = vmatprep.mubr.msk.f32.mxu0 %vm3961_vm15, %v3939_v13 }
 0x57d   : > { %v2522_v26 = vpop.permute.xlu1 %2521  ;;  %v2438_v27 = vpop.permute.xlu0 %2437  ;;  %3733 = vmatprep.subr.bf16.mxu1 %v3960_v19  ;;  %3736 = vmatprep.subr.bf16.mxu0 %v3960_v19 }
 0x57e   : > { %3640 = vmatmul.mubr.msk.f32.vlgmr.msra.gmra.mrb[44].mxu1 %vm446_vm1, %v2438_v27  ;;  %3647 = vmatmul.mubr.msk.f32.vlgmr.msra.gmra.mrb[46].mxu0 %vm446_vm1, %v2522_v26 }
 0x57f   : > { %3735 = vmatpush3.bf16.msra.mxu1 %v4477_v20  ;;  %3738 = vmatpush3.bf16.msra.mxu0 %v4477_v20 }
 0x580   : > { %3653 = vmatprep.mubr.msk.f32.mxu1 %vm3961_vm15, %v3939_v13  ;;  %3660 = vmatprep.mubr.msk.f32.mxu0 %vm3961_vm15, %v3939_v13 }
 0x581   : > { %v2610_v28 = vpop.permute.xlu0 %2609  ;;  %v2781_v29 = vpop.permute.xlu1 %2780  ;;  %3739 = vmatprep.subr.bf16.mxu1 %v3960_v19  ;;  %3742 = vmatprep.subr.bf16.mxu0 %v3960_v19 }
 0x582   : > { %3654 = vmatmul.mubr.msk.f32.vlgmr.msra.gmra.mrb[46].mxu1 %vm446_vm1, %v2610_v28  ;;  %3661 = vmatmul.mubr.msk.f32.vlgmr.msra.gmra.mrb[48].mxu0 %vm446_vm1, %v2012_v52 }
 0x583   : > { %3741 = vmatpush3.bf16.msra.mxu1 %v4477_v20  ;;  %3744 = vmatpush3.bf16.msra.mxu0 %v4477_v20 }
 0x584   : > { %3667 = vmatprep.mubr.msk.f32.mxu1 %vm3961_vm15, %v3939_v13  ;;  %3674 = vmatprep.mubr.msk.f32.mxu0 %vm3961_vm15, %v3939_v13 }
 0x585   : > { %v2865_v30 = vpop.permute.xlu0 %2864  ;;  %v2953_v31 = vpop.permute.xlu1 %2952  ;;  %3745 = vmatprep.subr.bf16.mxu1 %v3960_v19  ;;  %3748 = vmatprep.subr.bf16.mxu0 %v3960_v19 }
 0x586   : > { %3668 = vmatmul.mubr.msk.f32.vlgmr.msra.gmra.mrb[48].mxu1 %vm446_vm1, %v2781_v29  ;;  %3675 = vmatmul.mubr.msk.f32.vlgmr.msra.gmra.mrb[50].mxu0 %vm446_vm1, %v2865_v30 }
 0x587   : > { %3747 = vmatpush3.bf16.msra.mxu1 %v4477_v20  ;;  %3750 = vmatpush3.bf16.msra.mxu0 %v4477_v20 }
 0x588   : > { %3681 = vmatprep.mubr.msk.f32.mxu1 %vm3961_vm15, %v3939_v13  ;;  %3688 = vmatprep.mubr.msk.f32.mxu0 %vm3961_vm15, %v3939_v13 }
 0x589   : > { %v3037_v32 = vpop.permute.xlu0 %3036  ;;  %3751 = vmatprep.subr.bf16.mxu1 %v3960_v19  ;;  %3754 = vmatprep.subr.bf16.mxu0 %v3960_v19  ;;  %v3125_v51 = vpop.permute.xlu1 %3124 }
 0x58a   : > { %3682 = vmatmul.mubr.msk.f32.vlgmr.msra.gmra.mrb[50].mxu1 %vm446_vm1, %v2953_v31  ;;  %3689 = vmatmul.mubr.msk.f32.vlgmr.msra.gmra.mrb[52].mxu0 %vm446_vm1, %v3037_v32 }
 0x58b   : > { %3753 = vmatpush3.bf16.msra.mxu1 %v4477_v20  ;;  %3756 = vmatpush3.bf16.msra.mxu0 %v4477_v20 }
 0x58c   : > { %3695 = vmatprep.mubr.msk.f32.mxu1 %vm3961_vm15, %v3939_v13  ;;  %3702 = vmatprep.mubr.msk.f32.mxu0 %vm3961_vm15, %v3939_v13 }
 0x58d   : > { %v3209_v33 = vpop.permute.xlu0 %3208  ;;  %3757 = vmatprep.subr.bf16.mxu1 %v3960_v19  ;;  %v3297_v34 = vpop.permute.xlu1 %3296 }
 0x58e   : > { %3696 = vmatmul.mubr.msk.f32.vlgmr.msra.gmra.mrb[52].mxu1 %vm446_vm1, %v3125_v51  ;;  %3703 = vmatmul.mubr.msk.f32.vlgmr.msra.gmra.mrb[54].mxu0 %vm446_vm1, %v3209_v33 }
 0x58f   : > { %3759 = vmatpush3.bf16.msra.mxu1 %v4477_v20  ;;  %3709 = vmatprep.mubr.msk.f32.mxu1 %vm3961_vm15, %v3939_v13 }
 0x592   : > { %3710 = vmatmul.mubr.msk.f32.vlgmr.msra.gmra.mrb[54].mxu1 %vm446_vm1, %v3297_v34  ;;  %vm2173_vm1 = vcmask 519424  }
 0x5d7   : > { %v2084_v35 = vpop.f32.mrb[40].mxu0 }
 0x5d8   : > { %v2162_v36 = vmul.f32 0.25, %v2084_v35  ;;  %v2163_v24 = vmul.f32 0.75, %v2084_v35  ;;  %v3606_v37 = vpop.f32.mrb[41].mxu0 }
 0x5da   : > { %v2164_v38 = vadd.f32 %v2163_v24, %v2162_v36 }
 0x5dc   : > { %2168 = vst.msk [vmem:[%s4572_s14] sm:$0xf] %vm2167_vm0, %v2164_v38 }
 0x649   : > { %v2158_v19 = vpop.f32.mrb[40].mxu1  ;;  %v2245_v20 = vpop.f32.mrb[42].mxu0 }
 0x64a   : > { %v2165_v39 = vmul.f32 0.25, %v2158_v19  ;;  %v2249_v13 = vmul.f32 0.75, %v2158_v19  ;;  %v2251_v40 = vmul.f32 0.25, %v2245_v20  ;;  %v2339_v41 = vmul.f32 0.75, %v2245_v20  ;;  %v3613_v3 = vpop.f32.mrb[41].mxu1  ;;  %v3620_v4 = vpop.f32.mrb[43].mxu0 }
 0x64c   : > { %v2166_v43 = vadd.f32 %v2165_v39, %v2163_v24  ;;  %v2252_v44 = vadd.f32 %v2251_v40, %v2249_v13  ;;  %v2340_v45 = vadd.f32 %v2339_v41, %v2165_v39  ;;  %v2250_v55 = vadd.f32 %v2249_v13, %v2162_v36 }
 0x64d   : > { %v2335_v46 = vpop.f32.mrb[42].mxu1  ;;  %v2419_v22 = vpop.f32.mrb[44].mxu0 }
 0x64e   : > { %2343 = vst.msk [vmem:[%s4572_s14 + $0x4] sm:$0xf] %vm2167_vm0, %v2340_v45  ;;  %v2341_v48 = vmul.f32 0.25, %v2335_v46  ;;  %v2423_v49 = vmul.f32 0.75, %v2335_v46  ;;  %v2425_v50 = vmul.f32 0.25, %v2419_v22  ;;  %v2511_v2 = vmul.f32 0.75, %v2419_v22  ;;  %2170 = vrot.lane.b32.xlu0 %v2166_v43, %s3962_s20 }
 0x64f   : > { %v3634_v42 = vpop.f32.mrb[45].mxu0  ;;  %v3627_v54 = vpop.f32.mrb[43].mxu1 }
 0x650   : > { %v2342_v47 = vadd.f32 %v2341_v48, %v2339_v41  ;;  %v2424_v56 = vadd.f32 %v2423_v49, %v2251_v40  ;;  %v2426_v57 = vadd.f32 %v2425_v50, %v2423_v49  ;;  %v2512_v58 = vadd.f32 %v2511_v2, %v2341_v48 }
 0x651   : > { %v2507_v59 = vpop.f32.mrb[44].mxu1  ;;  %v2591_v60 = vpop.f32.mrb[46].mxu0 }
 0x652   : > { %2515 = vst.msk [vmem:[%s4572_s14 + $0x8] sm:$0xf] %vm2167_vm0, %v2512_v58  ;;  %v2513_v61 = vmul.f32 0.25, %v2507_v59  ;;  %v2595_v62 = vmul.f32 0.75, %v2507_v59  ;;  %v2597_v63 = vmul.f32 0.25, %v2591_v60  ;;  %v2683_v0 = vmul.f32 0.75, %v2591_v60  ;;  %2254 = vrot.lane.b32.xlu0 %v2250_v55, %s4766_s29  ;;  %2345 = vrot.lane.b32.xlu1 %v2342_v47, %s3962_s20 }
 0x653   : > { %v3648_v5 = vpop.f32.mrb[47].mxu0  ;;  %v3641_v6 = vpop.f32.mrb[45].mxu1 }
 0x654   : > { %v2514_v7 = vadd.f32 %v2513_v61, %v2511_v2  ;;  %v2596_v8 = vadd.f32 %v2595_v62, %v2425_v50  ;;  %v2598_v9 = vadd.f32 %v2597_v63, %v2595_v62  ;;  %v2684_v10 = vadd.f32 %v2683_v0, %v2513_v61 }
 0x655   : > { %v2679_v11 = vpop.f32.mrb[46].mxu1  ;;  %v2762_v21 = vpop.f32.mrb[48].mxu0 }
 0x656   : > { %2687 = vst.msk [vmem:[%s4572_s14 + $0xc] sm:$0xf] %vm2167_vm0, %v2684_v10  ;;  %v2685_v53 = vmul.f32 0.25, %v2679_v11  ;;  %v2766_v12 = vmul.f32 0.75, %v2679_v11  ;;  %v2768_v14 = vmul.f32 0.25, %v2762_v21  ;;  %v2854_v15 = vmul.f32 0.75, %v2762_v21  ;;  %2260 = vrot.lane.b32.xlu0 %v2252_v44, %s4765_s19  ;;  %2428 = vrot.lane.b32.xlu1 %v2424_v56, %s4766_s29 }
 0x657   : > { %v3662_v16 = vpop.f32.mrb[49].mxu0  ;;  %v3655_v17 = vpop.f32.mrb[47].mxu1 }
 0x658   : > { %v2686_v52 = vadd.f32 %v2685_v53, %v2683_v0  ;;  %v2767_v1 = vadd.f32 %v2766_v12, %v2597_v63  ;;  %v2769_v18 = vadd.f32 %v2768_v14, %v2766_v12  ;;  %v2855_v23 = vadd.f32 %v2854_v15, %v2685_v53 }
 0x659   : > { %v2850_v25 = vpop.f32.mrb[48].mxu1  ;;  %v2934_v26 = vpop.f32.mrb[50].mxu0 }
 0x65a   : > { %2858 = vst.msk [vmem:[%s4572_s14 + $0x10] sm:$0xf] %vm2167_vm0, %v2855_v23  ;;  %v2856_v27 = vmul.f32 0.25, %v2850_v25  ;;  %v2938_v28 = vmul.f32 0.75, %v2850_v25  ;;  %v2940_v29 = vmul.f32 0.25, %v2934_v26  ;;  %v3026_v30 = vmul.f32 0.75, %v2934_v26  ;;  %2433 = vrot.lane.b32.xlu1 %v2426_v57, %s4765_s19  ;;  %2517 = vrot.lane.b32.xlu0 %v2514_v7, %s3962_s20 }
 0x65b   : > { %v3676_v31 = vpop.f32.mrb[51].mxu0  ;;  %v3669_v32 = vpop.f32.mrb[49].mxu1 }
 0x65c   : > { %v2857_v51 = vadd.f32 %v2856_v27, %v2854_v15  ;;  %v2939_v33 = vadd.f32 %v2938_v28, %v2768_v14  ;;  %v2941_v34 = vadd.f32 %v2940_v29, %v2938_v28  ;;  %v3027_v35 = vadd.f32 %v3026_v30, %v2856_v27 }
 0x65d   : > { %v3022_v36 = vpop.f32.mrb[50].mxu1  ;;  %v3106_v24 = vpop.f32.mrb[52].mxu0 }
 0x65e   : > { %3030 = vst.msk [vmem:[%s4572_s14 + $0x14] sm:$0xf] %vm2167_vm0, %v3027_v35  ;;  %v3028_v37 = vmul.f32 0.25, %v3022_v36  ;;  %v3110_v38 = vmul.f32 0.75, %v3022_v36  ;;  %v3112_v19 = vmul.f32 0.25, %v3106_v24  ;;  %v3198_v20 = vmul.f32 0.75, %v3106_v24  ;;  %2600 = vrot.lane.b32.xlu0 %v2596_v8, %s4766_s29  ;;  %2689 = vrot.lane.b32.xlu1 %v2686_v52, %s3962_s20 }
 0x65f   : > { %v3690_v39 = vpop.f32.mrb[53].mxu0  ;;  %v3683_v13 = vpop.f32.mrb[51].mxu1 }
 0x660   : > { %v3029_v40 = vadd.f32 %v3028_v37, %v3026_v30  ;;  %v3111_v41 = vadd.f32 %v3110_v38, %v2940_v29  ;;  %v3113_v3 = vadd.f32 %v3112_v19, %v3110_v38  ;;  %v3199_v4 = vadd.f32 %v3198_v20, %v3028_v37 }
 0x661   : > { %v3194_v43 = vpop.f32.mrb[52].mxu1  ;;  %v3278_v44 = vpop.f32.mrb[54].mxu0 }
 0x662   : > { %3202 = vst.msk [vmem:[%s4572_s14 + $0x18] sm:$0xf] %vm2167_vm0, %v3199_v4  ;;  %v3200_v45 = vmul.f32 0.25, %v3194_v43  ;;  %v3282_v46 = vmul.f32 0.75, %v3194_v43  ;;  %v3284_v22 = vmul.f32 0.25, %v3278_v44  ;;  %v3370_v48 = vmul.f32 0.75, %v3278_v44  ;;  %2605 = vrot.lane.b32.xlu0 %v2598_v9, %s4765_s19  ;;  %2771 = vrot.lane.b32.xlu1 %v2767_v1, %s4766_s29 }
 0x663   : > { %v3704_v49 = vpop.f32.mrb[55].mxu0  ;;  %v3697_v50 = vpop.f32.mrb[53].mxu1 }
 0x664   : > { %v3201_v2 = vadd.f32 %v3200_v45, %v3198_v20  ;;  %v3283_v42 = vadd.f32 %v3282_v46, %v3112_v19  ;;  %v3285_v54 = vadd.f32 %v3284_v22, %v3282_v46  ;;  %v3371_v55 = vadd.f32 %v3370_v48, %v3200_v45 }
 0x665   : > { %v3366_v47 = vpop.f32.mrb[54].mxu1 }
 0x666   : > { %3374 = vst.msk [vmem:[%s4572_s14 + $0x1c] sm:$0xf] %vm2167_vm0, %v3371_v55  ;;  %v3372_v56 = vmul.f32 0.25, %v3366_v47  ;;  %v3380_v57 = vmul.f32 0.75, %v3366_v47  ;;  %2776 = vrot.lane.b32.xlu1 %v2769_v18, %s4765_s19  ;;  %2860 = vrot.lane.b32.xlu0 %v2857_v51, %s3962_s20  ;;  %v3711_v58 = vpop.f32.mrb[55].mxu1 }
 0x668   : > { %v3373_v59 = vadd.f32 %v3372_v56, %v3370_v48  ;;  %v3381_v60 = vadd.f32 %v3380_v57, %v3284_v22  ;;  %v3382_v61 = vadd.f32 %v3380_v57, %v3372_v56 }
 0x66a   : > { %2943 = vrot.lane.b32.xlu0 %v2939_v33, %s4766_s29  ;;  %3032 = vrot.lane.b32.xlu1 %v3029_v40, %s3962_s20 }
 0x66e   : > { %2948 = vrot.lane.b32.xlu0 %v2941_v34, %s4765_s19  ;;  %3115 = vrot.lane.b32.xlu1 %v3111_v41, %s4766_s29 }
 0x672   : > { %3120 = vrot.lane.b32.xlu1 %v3113_v3, %s4765_s19  ;;  %3204 = vrot.lane.b32.xlu0 %v3201_v2, %s3962_s20 }
 0x676   : > { %3287 = vrot.lane.b32.xlu0 %v3283_v42, %s4766_s29  ;;  %3376 = vrot.lane.b32.xlu1 %v3373_v59, %s3962_s20  ;;  %s3871_s20 = sshll.u32 %s3964_s27, 4  ;;  %s3872_s20 = int_to_ptr.vmem [resolvable:$false] %s3871_s20 }
 0x677   : > { %s3873_s13 = scalar_lea.vmem %s3872_s20, 1024  ;;  %p3874_p8 = scmp.lt.s32.totalorder %s4667_s17, %s3872_s20 }
 0x67a   : > { %3292 = vrot.lane.b32.xlu0 %v3285_v54, %s4765_s19  ;;  %3384 = vrot.lane.b32.xlu1 %v3381_v60, %s4766_s29  ;;  %s3394_s29 = scalar_lea.sflag [#allocation5], %s4134_s26 }
 0x67e   : > { %3389 = vrot.lane.b32.xlu1 %v3382_v61, %s4765_s19  ;;  %s3551_s19 = sshll.u32 %s4051_s25, 9  ;;  %s3867_s25 = scalar_lea.vmem %s4667_s17, 512 }
 0x67f   : > { %s4665_s30 = scalar_lea.hbm %s4723_s12, %s3551_s19  ;;  %p3868_p6 = scmp.ne.s32.totalorder %s4667_s17, %s3867_s25 }
 0x680   : > { %p3875_p10 = scmp.lt.s32.totalorder %s3873_s13, %s3867_s25 }
 0x681   : > { %p3869_p12 = pnand %p3868_p6, %p4769_p11 }
 0x682   : > { %p3876_p0 = por %p3875_p10, %p3874_p8 }
 0x683   : > { %p3870_p13 = pneg %p3869_p12 }
 0x685   : > { %p3877_p2 = pnand %p3876_p0, %p3870_p13 }
 0x6c0   : > { %v2171_v62 = vpop.permute.xlu0 %2170 }
 0x6c1   : > { %2174 = vst.msk [vmem:[%s4572_s14] sm:$0xf] %vm2173_vm1, %v2171_v62 }
 0x6c4   : > { %v2255_v63 = vpop.permute.xlu0 %2254  ;;  %v2346_v0 = vpop.permute.xlu1 %2345 }
 0x6c5   : > { %2258 = vst.msk [vmem:[%s4572_s14] sm:$0xf] %vm2257_vm2, %v2255_v63 }
 0x6c6   : > { %2348 = vst.msk [vmem:[%s4572_s14 + $0x4] sm:$0xf] %vm2173_vm1, %v2346_v0 }
 0x6c8   : > { %v2261_v5 = vpop.permute.xlu0 %2260  ;;  %v2429_v6 = vpop.permute.xlu1 %2428 }
 0x6c9   : > { %2264 = vst.msk [vmem:[%s4572_s14] sm:$0xf] %vm2263_vm3, %v2261_v5 }
 0x6ca   : > { %2431 = vst.msk [vmem:[%s4572_s14 + $0x4] sm:$0xf] %vm2257_vm2, %v2429_v6 }
 0x6cc   : > { %v2434_v7 = vpop.permute.xlu1 %2433  ;;  %v2518_v8 = vpop.permute.xlu0 %2517 }
 0x6cd   : > { %2436 = vst.msk [vmem:[%s4572_s14 + $0x4] sm:$0xf] %vm2263_vm3, %v2434_v7 }
 0x6ce   : > { %2520 = vst.msk [vmem:[%s4572_s14 + $0x8] sm:$0xf] %vm2173_vm1, %v2518_v8 }
 0x6d0   : > { %v2601_v9 = vpop.permute.xlu0 %2600  ;;  %v2690_v10 = vpop.permute.xlu1 %2689 }
 0x6d1   : > { %2603 = vst.msk [vmem:[%s4572_s14 + $0x8] sm:$0xf] %vm2257_vm2, %v2601_v9 }
 0x6d2   : > { %2692 = vst.msk [vmem:[%s4572_s14 + $0xc] sm:$0xf] %vm2173_vm1, %v2690_v10 }
 0x6d4   : > { %v2606_v11 = vpop.permute.xlu0 %2605  ;;  %v2772_v21 = vpop.permute.xlu1 %2771 }
 0x6d5   : > { %2608 = vst.msk [vmem:[%s4572_s14 + $0x8] sm:$0xf] %vm2263_vm3, %v2606_v11 }
 0x6d6   : > { %2774 = vst.msk [vmem:[%s4572_s14 + $0xc] sm:$0xf] %vm2257_vm2, %v2772_v21 }
 0x6d8   : > { %v2777_v53 = vpop.permute.xlu1 %2776  ;;  %v2861_v12 = vpop.permute.xlu0 %2860 }
 0x6d9   : > { %2779 = vst.msk [vmem:[%s4572_s14 + $0xc] sm:$0xf] %vm2263_vm3, %v2777_v53 }
 0x6da   : > { %2863 = vst.msk [vmem:[%s4572_s14 + $0x10] sm:$0xf] %vm2173_vm1, %v2861_v12 }
 0x6dc   : > { %v2944_v14 = vpop.permute.xlu0 %2943  ;;  %v3033_v15 = vpop.permute.xlu1 %3032 }
 0x6dd   : > { %2946 = vst.msk [vmem:[%s4572_s14 + $0x10] sm:$0xf] %vm2257_vm2, %v2944_v14 }
 0x6de   : > { %3035 = vst.msk [vmem:[%s4572_s14 + $0x14] sm:$0xf] %vm2173_vm1, %v3033_v15 }
 0x6e0   : > { %v2949_v16 = vpop.permute.xlu0 %2948  ;;  %v3116_v17 = vpop.permute.xlu1 %3115 }
 0x6e1   : > { %2951 = vst.msk [vmem:[%s4572_s14 + $0x10] sm:$0xf] %vm2263_vm3, %v2949_v16 }
 0x6e2   : > { %3118 = vst.msk [vmem:[%s4572_s14 + $0x14] sm:$0xf] %vm2257_vm2, %v3116_v17 }
 0x6e4   : > { %v3121_v52 = vpop.permute.xlu1 %3120  ;;  %v3205_v1 = vpop.permute.xlu0 %3204 }
 0x6e5   : > { %3123 = vst.msk [vmem:[%s4572_s14 + $0x14] sm:$0xf] %vm2263_vm3, %v3121_v52 }
 0x6e6   : > { %3207 = vst.msk [vmem:[%s4572_s14 + $0x18] sm:$0xf] %vm2173_vm1, %v3205_v1 }
 0x6e8   : > { %v3288_v18 = vpop.permute.xlu0 %3287  ;;  %v3377_v23 = vpop.permute.xlu1 %3376 }
 0x6e9   : > { %3290 = vst.msk [vmem:[%s4572_s14 + $0x18] sm:$0xf] %vm2257_vm2, %v3288_v18 }
 0x6ea   : > { %3379 = vst.msk [vmem:[%s4572_s14 + $0x1c] sm:$0xf] %vm2173_vm1, %v3377_v23 }
 0x6ec   : > { %v3293_v25 = vpop.permute.xlu0 %3292  ;;  %v3385_v26 = vpop.permute.xlu1 %3384 }
 0x6ed   : > { %3295 = vst.msk [vmem:[%s4572_s14 + $0x18] sm:$0xf] %vm2263_vm3, %v3293_v25 }
 0x6ee   : > { %3387 = vst.msk [vmem:[%s4572_s14 + $0x1c] sm:$0xf] %vm2257_vm2, %v3385_v26 }
 0x6f0   : > { %v3390_v27 = vpop.permute.xlu1 %3389 }
 0x6f1   : > { %3392 = vst.msk [vmem:[%s4572_s14 + $0x1c] sm:$0xf] %vm2263_vm3, %v3390_v27 }
 0x6f2   : > { %3880 = shalt.err (!%p3877_p2)
}
 0x6f3   : > { %s3881_s26 = scalar_lea.hbm %s4665_s30, 512  ;;  %s3885_s19 = scalar_lea.hbm %s4723_s12, 1024 }
 0x6f4   : > { %p3882_p4 = scmp.ne.s32.totalorder %s4665_s30, %s3881_s26  ;;  %p3886_p9 = scmp.lt.u32.totalorder %s4665_s30, %s4723_s12 }
 0x6f5   : > { %p3887_p1 = scmp.lt.u32.totalorder %s3885_s19, %s3881_s26  ;;  %p3889_p6 = scmp.lt.u32.totalorder %s3881_s26, %s4665_s30 }
 0x6f6   : > { %p3883_p5 = pnand %p3882_p4, %p4769_p11 }
 0x6f7   : > { %p3888_p3 = por %p3887_p1, %p3886_p9 }
 0x6f8   : > { %p3884_p7 = pneg %p3883_p5 }
 0x6f9   : > { %p3890_p12 = por %p3889_p6, %p3888_p3 }
 0x6fb   : > { %p3891_p13 = pnand %p3890_p12, %p3884_p7 }
 0x6fd   : > { %3894 = shalt.err (!%p3891_p13)
}
 0x6fe   : > { %3762 = dma.vmem_to_hbm [thread:$0]  (%p4769_p11), %s4667_s17, 512, %s4665_s30, %s3394_s29  }
 0x6ff PF: > { %s3420_s25 = sand.u32 1, %s3921_s21   ;;  %p4770_p8 = scmp.ne.s32.totalorder %s4755_s16, 0 }
 0x700   : > { %p4771_p10 = scmp.ge.s32.totalorder %s3933_s24, 2  ;;  %s3421_s27 = scalar_lea.sflag [#allocation5], %s3420_s25 }
 0x702   : > { %p3769_p0 = pnand %p4771_p10, %p4770_p8 }
 0x704   : > { %3916 = dma.done.wait (!%p3769_p0), %s3421_s27, 512  }
 0x705   : > { %3918 = vsyncadd (!%p3769_p0), %s3421_s27, 4294966784  ;;  %s4772_s24 = sld [smem:[#allocation10_spill]]  ;;  %s4773_s20 = sld [smem:[#allocation9_spill]] }
 0x706   : > { %s4774_s23 = sld [smem:[#allocation11_spill]]  ;;  %s4775_s21 = smov %s3925_s22 }
 0x70b   : > { %p25_p2 = scmp.ge.s32.totalorder %s4772_s24, 4   ;;  %s4776_s22 = smov %s4773_s20 }
 0x70d   :  { %27 = sbr.rel (!%p25_p2) target bundleno = 5 (0x5), region = 115 }
 0x714   :  { %3426 = vsyncpa [#allocation4], 1 }
 0x715   :  { %3428 = vsyncpa [#allocation4 + $0x1], 1 }
 0x716   :  { %3429 = vsyncpa [#allocation5], 1 }
 0x717   :  { %3431 = vsyncpa [#allocation5 + $0x1], 1 }

</bundles_post_ra>
